<compile_context>
chip_gen: v5e
topology: v5e:2x2
jax: 0.10.0
libtpu: 0.0.40
codegen_flags: <defaults>
</compile_context>

<pallas_src>
import functools

import jax
import jax.numpy as jnp
import numpy as np
from jax import lax
from jax.experimental import pallas as pl
from jax.experimental.pallas import tpu as pltpu


def lstm_point_predict_kernel(
    x_ref,         # (T*B, 3)         time-major input, (t, b) flattened to rows
    e_wih_ref,     # (3, 4*He)        encoder W_ih^T
    e_whh_ref,     # (He, 4*He)       encoder W_hh^T
    e_b_ref,       # (1, 4*He)        encoder b_ih + b_hh
    d_wih_ref,     # (He, 4*Hd)       decoder W_ih^T
    d_whh_ref,     # (Hd, 4*Hd)       decoder W_hh^T
    d_b_ref,       # (1, 4*Hd)        decoder b_ih + b_hh
    fc_w_ref,      # (Hd, 2)          fc weight^T
    fc_b_ref,      # (1, 2)           fc bias
    out_ref,       # (B, 2)           logits
    enc_gates_ref, # scratch (T*B, 4*He) precomputed encoder input gates
    enc_h_ref,     # scratch (T*B, He)   encoder hidden states
    dec_gates_ref, # scratch (T*B, 4*Hd) precomputed decoder input gates
    *, T, B,
):
    He = e_whh_ref.shape[0]
    Hd = d_whh_ref.shape[0]

    # ---- hoisted, batched encoder input projection (bias folded in once) ----
    enc_gates_ref[...] = (
        jnp.dot(x_ref[...], e_wih_ref[...], preferred_element_type=jnp.float32)
        + e_b_ref[...])

    def cell(pre_gates, h, c, whh, H):
        # Only the serial h @ W_hh matmul remains on the per-step critical path.
        gates = pre_gates + jnp.dot(h, whh, preferred_element_type=jnp.float32)
        # Activations on the full (B, 4H) vreg: 1 sigmoid + 1 tanh EUP pass,
        # gate slicing deferred to cheap VPU ops below.
        sig = jax.nn.sigmoid(gates)
        tnh = jnp.tanh(gates)
        i = sig[:, 0:H]
        f = sig[:, H:2 * H]
        o = sig[:, 3 * H:4 * H]
        g = tnh[:, 2 * H:3 * H]
        c_new = f * c + i * g
        h_new = o * jnp.tanh(c_new)
        return h_new, c_new

    # --------------------------- encoder LSTM ------------------------------
    e_whh = e_whh_ref[...]

    def enc_step(t, carry):
        h, c = carry
        row = pl.multiple_of(t * B, B)
        pre = enc_gates_ref[pl.ds(row, B), :]
        h, c = cell(pre, h, c, e_whh, He)
        enc_h_ref[pl.ds(row, B), :] = h      # dropout == identity (eval mode)
        return (h, c)

    h0 = jnp.zeros((B, He), jnp.float32)
    c0 = jnp.zeros((B, He), jnp.float32)
    lax.fori_loop(0, T, enc_step, (h0, c0), unroll=True)

    # ---- hoisted, batched decoder input projection (lane-dense 4*Hd wide) ----
    dec_gates_ref[...] = (
        jnp.dot(enc_h_ref[...], d_wih_ref[...],
                preferred_element_type=jnp.float32)
        + d_b_ref[...])

    # --------------------------- decoder LSTM ------------------------------
    d_whh = d_whh_ref[...]

    def dec_step(t, carry):
        h, c = carry
        row = pl.multiple_of(t * B, B)
        pre = dec_gates_ref[pl.ds(row, B), :]
        return cell(pre, h, c, d_whh, Hd)

    hd0 = jnp.zeros((B, Hd), jnp.float32)
    cd0 = jnp.zeros((B, Hd), jnp.float32)
    h_last, _ = lax.fori_loop(0, T, dec_step, (hd0, cd0), unroll=True)

    # TODO(synk): nn.Dropout treated as identity (inference-mode semantics);
    # training-mode parity would need pltpu.prng_seed + prng_random_bits masks.
    # ------------------ final Linear(dec_hidden, 2) on last h ---------------
    out_ref[...] = (jnp.dot(h_last, fc_w_ref[...],
                            preferred_element_type=jnp.float32)
                    + fc_b_ref[...])


def lstm_point_predict(x, params):
    """x: (B, T, 3) float32, batch_first like PyTorch. Returns (B, 2) logits."""
    B, T, _ = x.shape
    He = params["e_whh"].shape[1]
    Hd = params["d_whh"].shape[1]

    # time-major then flatten (T, B) -> rows so the kernel's batched encoder
    # input projection is a single (T*B, 3) @ (3, 4*He) MXU matmul.
    x_rows = jnp.transpose(x, (1, 0, 2)).reshape(T * B, 3).astype(jnp.float32)

    args = (
        x_rows,
        params["e_wih"].T, params["e_whh"].T,
        (params["e_bih"] + params["e_bhh"])[None, :],
        params["d_wih"].T, params["d_whh"].T,
        (params["d_bih"] + params["d_bhh"])[None, :],
        params["fc_w"].T, params["fc_b"][None, :],
    )

    kernel = functools.partial(lstm_point_predict_kernel, T=T, B=B)

    flops = 2 * T * B * (3 * 4 * He + He * 4 * He + He * 4 * Hd + Hd * 4 * Hd) \
        + 2 * B * Hd * 2
    transcendentals = T * B * 9 * (He + Hd)
    bytes_accessed = int(sum(np.prod(a.shape) for a in args) * 4 + B * 2 * 4)

    return pl.pallas_call(
        kernel,
        out_shape=jax.ShapeDtypeStruct((B, 2), jnp.float32),
        in_specs=[pl.BlockSpec(memory_space=pltpu.MemorySpace.VMEM)] * len(args),
        out_specs=pl.BlockSpec(memory_space=pltpu.MemorySpace.VMEM),
        scratch_shapes=[
            pltpu.VMEM((T * B, 4 * He), jnp.float32),   # enc precomputed gates
            pltpu.VMEM((T * B, He), jnp.float32),       # enc hidden states
            pltpu.VMEM((T * B, 4 * Hd), jnp.float32),   # dec precomputed gates
        ],
        cost_estimate=pl.CostEstimate(
            flops=flops,
            transcendentals=transcendentals,
            bytes_accessed=bytes_accessed),
    )(*args)


def make_params(key, enc_hidden, dec_hidden):
    """Deterministic synthetic parameters with PyTorch-LSTM-like shapes."""
    ks = jax.random.split(key, 10)
    se = 1.0 / np.sqrt(enc_hidden)
    sd = 1.0 / np.sqrt(dec_hidden)

    def u(k, shape, s):
        return jax.random.uniform(k, shape, jnp.float32, -s, s)

    return {
        "e_wih": u(ks[0], (4 * enc_hidden, 3), se),
        "e_whh": u(ks[1], (4 * enc_hidden, enc_hidden), se),
        "e_bih": u(ks[2], (4 * enc_hidden,), se),
        "e_bhh": u(ks[3], (4 * enc_hidden,), se),
        "d_wih": u(ks[4], (4 * dec_hidden, enc_hidden), sd),
        "d_whh": u(ks[5], (4 * dec_hidden, dec_hidden), sd),
        "d_bih": u(ks[6], (4 * dec_hidden,), sd),
        "d_bhh": u(ks[7], (4 * dec_hidden,), sd),
        "fc_w": u(ks[8], (2, dec_hidden), sd),
        "fc_b": u(ks[9], (2,), sd),
    }


def ref_forward(x, params):
    """Pure-JAX reference matching PyTorch LSTM semantics (eval mode)."""
    def lstm(x_seq, wih, whh, bih, bhh, H):
        B = x_seq.shape[0]

        def step(carry, x_t):
            h, c = carry
            g = x_t @ wih.T + h @ whh.T + bih + bhh
            i = jax.nn.sigmoid(g[:, :H])
            f = jax.nn.sigmoid(g[:, H:2 * H])
            gg = jnp.tanh(g[:, 2 * H:3 * H])
            o = jax.nn.sigmoid(g[:, 3 * H:])
            c = f * c + i * gg
            h = o * jnp.tanh(c)
            return (h, c), h

        init = (jnp.zeros((B, H), jnp.float32), jnp.zeros((B, H), jnp.float32))
        _, hs = lax.scan(step, init, jnp.transpose(x_seq, (1, 0, 2)))
        return jnp.transpose(hs, (1, 0, 2))

    He = params["e_whh"].shape[1]
    Hd = params["d_whh"].shape[1]
    eo = lstm(x, params["e_wih"], params["e_whh"],
              params["e_bih"], params["e_bhh"], He)
    do = lstm(eo, params["d_wih"], params["d_whh"],
              params["d_bih"], params["d_bhh"], Hd)
    return do[:, -1] @ params["fc_w"].T + params["fc_b"]


if __name__ == "__main__":
    B, T = 8, 8
    enc_hidden, dec_hidden = 32, 32

    key = jax.random.PRNGKey(0)
    k_x, k_p = jax.random.split(key)
    x = jax.random.normal(k_x, (B, T, 3), jnp.float32)
    params = make_params(k_p, enc_hidden, dec_hidden)

    logits = lstm_point_predict(x, params)
    logits = jax.block_until_ready(logits)

    ref = jax.block_until_ready(ref_forward(x, params))
    np.testing.assert_allclose(np.asarray(logits), np.asarray(ref),
                               rtol=1e-4, atol=1e-5)
    print("KERNEL_OK")
</pallas_src>

<mosaic_0001>
module attributes {stable_mosaic.version = 11 : i64} {
  func.func @lstm_point_predict_kernel(%arg0: memref<64x3xf32, #tpu.memory_space<vmem>>, %arg1: memref<3x128xf32, #tpu.memory_space<vmem>>, %arg2: memref<32x128xf32, #tpu.memory_space<vmem>>, %arg3: memref<1x128xf32, #tpu.memory_space<vmem>>, %arg4: memref<32x128xf32, #tpu.memory_space<vmem>>, %arg5: memref<32x128xf32, #tpu.memory_space<vmem>>, %arg6: memref<1x128xf32, #tpu.memory_space<vmem>>, %arg7: memref<32x2xf32, #tpu.memory_space<vmem>>, %arg8: memref<1x2xf32, #tpu.memory_space<vmem>>, %arg9: memref<8x2xf32, #tpu.memory_space<vmem>>, %arg10: memref<64x128xf32, #tpu.memory_space<vmem>>, %arg11: memref<64x32xf32, #tpu.memory_space<vmem>>, %arg12: memref<64x128xf32, #tpu.memory_space<vmem>>) attributes {dimension_semantics = [], scalar_prefetch = 0 : i64, scratch_operands = 3 : i64, tpu.core_type = #tpu.core_type<tc>} {
    %c0 = arith.constant 0 : index
    %c0_0 = arith.constant 0 : index
    %0 = vector.load %arg0[%c0, %c0_0] : memref<64x3xf32, #tpu.memory_space<vmem>>, vector<64x3xf32>
    %c0_1 = arith.constant 0 : index
    %c0_2 = arith.constant 0 : index
    %1 = vector.load %arg1[%c0_1, %c0_2] : memref<3x128xf32, #tpu.memory_space<vmem>>, vector<3x128xf32>
    %cst = arith.constant dense<0.000000e+00> : vector<64x128xf32>
    %2 = tpu.matmul %0, %1, %cst {dimension_numbers = #tpu.dot_dimension_numbers<[1], [0], [0], [1], [0, 0, 1, 1], [], []>} : vector<64x3xf32>, vector<3x128xf32>, vector<64x128xf32> -> vector<64x128xf32>
    %c0_3 = arith.constant 0 : index
    %c0_4 = arith.constant 0 : index
    %3 = vector.load %arg3[%c0_3, %c0_4] : memref<1x128xf32, #tpu.memory_space<vmem>>, vector<1x128xf32>
    %4 = vector.broadcast %3 : vector<1x128xf32> to vector<64x128xf32>
    %5 = arith.addf %2, %4 : vector<64x128xf32>
    %c0_5 = arith.constant 0 : index
    %c0_6 = arith.constant 0 : index
    %6 = vector.load %arg10[%c0_5, %c0_6] : memref<64x128xf32, #tpu.memory_space<vmem>>, vector<64x128xf32>
    tpu.vector_store %arg10[%c0_5, %c0_6], %5 {strides = array<i32>} : memref<64x128xf32, #tpu.memory_space<vmem>>, vector<64x128xf32>,
    %c0_7 = arith.constant 0 : index
    %c0_8 = arith.constant 0 : index
    %7 = vector.load %arg2[%c0_7, %c0_8] : memref<32x128xf32, #tpu.memory_space<vmem>>, vector<32x128xf32>
    %cst_9 = arith.constant 0.000000e+00 : f32
    %8 = vector.broadcast %cst_9 : f32 to vector<8x32xf32>
    %cst_10 = arith.constant 0.000000e+00 : f32
    %9 = vector.broadcast %cst_10 : f32 to vector<8x32xf32>
    %c0_i32 = arith.constant 0 : i32
    %c8_i32 = arith.constant 8 : i32
    %10 = arith.muli %c0_i32, %c8_i32 : i32
    %11 = tpu.assume_multiple %10, 8 : i32
    %12 = arith.index_cast %11 : i32 to index
    %c0_11 = arith.constant 0 : index
    %13 = vector.load %arg10[%12, %c0_11] : memref<64x128xf32, #tpu.memory_space<vmem>>, vector<8x128xf32>
    %cst_12 = arith.constant dense<0.000000e+00> : vector<8x128xf32>
    %14 = tpu.matmul %8, %7, %cst_12 {dimension_numbers = #tpu.dot_dimension_numbers<[1], [0], [0], [1], [0, 0, 1, 1], [], []>} : vector<8x32xf32>, vector<32x128xf32>, vector<8x128xf32> -> vector<8x128xf32>
    %15 = arith.addf %13, %14 : vector<8x128xf32>
    %16 = arith.negf %15 : vector<8x128xf32>
    %17 = math.exp %16 : vector<8x128xf32>
    %cst_13 = arith.constant 1.000000e+00 : f32
    %18 = vector.broadcast %cst_13 : f32 to vector<8x128xf32>
    %19 = arith.addf %18, %17 : vector<8x128xf32>
    %20 = arith.divf %18, %19 : vector<8x128xf32>
    %21 = math.tanh %15 : vector<8x128xf32>
    %22 = vector.extract_strided_slice %20 {offsets = [0, 0], sizes = [8, 32], strides = [1, 1]} : vector<8x128xf32> to vector<8x32xf32>
    %23 = vector.extract_strided_slice %20 {offsets = [0, 32], sizes = [8, 32], strides = [1, 1]} : vector<8x128xf32> to vector<8x32xf32>
    %24 = vector.extract_strided_slice %20 {offsets = [0, 96], sizes = [8, 32], strides = [1, 1]} : vector<8x128xf32> to vector<8x32xf32>
    %25 = vector.extract_strided_slice %21 {offsets = [0, 64], sizes = [8, 32], strides = [1, 1]} : vector<8x128xf32> to vector<8x32xf32>
    %26 = arith.mulf %23, %9 : vector<8x32xf32>
    %27 = arith.mulf %22, %25 : vector<8x32xf32>
    %28 = arith.addf %26, %27 : vector<8x32xf32>
    %29 = math.tanh %28 : vector<8x32xf32>
    %30 = arith.mulf %24, %29 : vector<8x32xf32>
    %31 = arith.index_cast %11 : i32 to index
    %c0_14 = arith.constant 0 : index
    %32 = vector.load %arg11[%31, %c0_14] : memref<64x32xf32, #tpu.memory_space<vmem>>, vector<8x32xf32>
    tpu.vector_store %arg11[%31, %c0_14], %30 {strides = array<i32>} : memref<64x32xf32, #tpu.memory_space<vmem>>, vector<8x32xf32>,
    %c1_i32 = arith.constant 1 : i32
    %c8_i32_15 = arith.constant 8 : i32
    %33 = arith.muli %c1_i32, %c8_i32_15 : i32
    %34 = tpu.assume_multiple %33, 8 : i32
    %35 = arith.index_cast %34 : i32 to index
    %c0_16 = arith.constant 0 : index
    %36 = vector.load %arg10[%35, %c0_16] : memref<64x128xf32, #tpu.memory_space<vmem>>, vector<8x128xf32>
    %cst_17 = arith.constant dense<0.000000e+00> : vector<8x128xf32>
    %37 = tpu.matmul %30, %7, %cst_17 {dimension_numbers = #tpu.dot_dimension_numbers<[1], [0], [0], [1], [0, 0, 1, 1], [], []>} : vector<8x32xf32>, vector<32x128xf32>, vector<8x128xf32> -> vector<8x128xf32>
    %38 = arith.addf %36, %37 : vector<8x128xf32>
    %39 = arith.negf %38 : vector<8x128xf32>
    %40 = math.exp %39 : vector<8x128xf32>
    %cst_18 = arith.constant 1.000000e+00 : f32
    %41 = vector.broadcast %cst_18 : f32 to vector<8x128xf32>
    %42 = arith.addf %41, %40 : vector<8x128xf32>
    %43 = arith.divf %41, %42 : vector<8x128xf32>
    %44 = math.tanh %38 : vector<8x128xf32>
    %45 = vector.extract_strided_slice %43 {offsets = [0, 0], sizes = [8, 32], strides = [1, 1]} : vector<8x128xf32> to vector<8x32xf32>
    %46 = vector.extract_strided_slice %43 {offsets = [0, 32], sizes = [8, 32], strides = [1, 1]} : vector<8x128xf32> to vector<8x32xf32>
    %47 = vector.extract_strided_slice %43 {offsets = [0, 96], sizes = [8, 32], strides = [1, 1]} : vector<8x128xf32> to vector<8x32xf32>
    %48 = vector.extract_strided_slice %44 {offsets = [0, 64], sizes = [8, 32], strides = [1, 1]} : vector<8x128xf32> to vector<8x32xf32>
    %49 = arith.mulf %46, %28 : vector<8x32xf32>
    %50 = arith.mulf %45, %48 : vector<8x32xf32>
    %51 = arith.addf %49, %50 : vector<8x32xf32>
    %52 = math.tanh %51 : vector<8x32xf32>
    %53 = arith.mulf %47, %52 : vector<8x32xf32>
    %54 = arith.index_cast %34 : i32 to index
    %c0_19 = arith.constant 0 : index
    %55 = vector.load %arg11[%54, %c0_19] : memref<64x32xf32, #tpu.memory_space<vmem>>, vector<8x32xf32>
    tpu.vector_store %arg11[%54, %c0_19], %53 {strides = array<i32>} : memref<64x32xf32, #tpu.memory_space<vmem>>, vector<8x32xf32>,
    %c2_i32 = arith.constant 2 : i32
    %c8_i32_20 = arith.constant 8 : i32
    %56 = arith.muli %c2_i32, %c8_i32_20 : i32
    %57 = tpu.assume_multiple %56, 8 : i32
    %58 = arith.index_cast %57 : i32 to index
    %c0_21 = arith.constant 0 : index
    %59 = vector.load %arg10[%58, %c0_21] : memref<64x128xf32, #tpu.memory_space<vmem>>, vector<8x128xf32>
    %cst_22 = arith.constant dense<0.000000e+00> : vector<8x128xf32>
    %60 = tpu.matmul %53, %7, %cst_22 {dimension_numbers = #tpu.dot_dimension_numbers<[1], [0], [0], [1], [0, 0, 1, 1], [], []>} : vector<8x32xf32>, vector<32x128xf32>, vector<8x128xf32> -> vector<8x128xf32>
    %61 = arith.addf %59, %60 : vector<8x128xf32>
    %62 = arith.negf %61 : vector<8x128xf32>
    %63 = math.exp %62 : vector<8x128xf32>
    %cst_23 = arith.constant 1.000000e+00 : f32
    %64 = vector.broadcast %cst_23 : f32 to vector<8x128xf32>
    %65 = arith.addf %64, %63 : vector<8x128xf32>
    %66 = arith.divf %64, %65 : vector<8x128xf32>
    %67 = math.tanh %61 : vector<8x128xf32>
    %68 = vector.extract_strided_slice %66 {offsets = [0, 0], sizes = [8, 32], strides = [1, 1]} : vector<8x128xf32> to vector<8x32xf32>
    %69 = vector.extract_strided_slice %66 {offsets = [0, 32], sizes = [8, 32], strides = [1, 1]} : vector<8x128xf32> to vector<8x32xf32>
    %70 = vector.extract_strided_slice %66 {offsets = [0, 96], sizes = [8, 32], strides = [1, 1]} : vector<8x128xf32> to vector<8x32xf32>
    %71 = vector.extract_strided_slice %67 {offsets = [0, 64], sizes = [8, 32], strides = [1, 1]} : vector<8x128xf32> to vector<8x32xf32>
    %72 = arith.mulf %69, %51 : vector<8x32xf32>
    %73 = arith.mulf %68, %71 : vector<8x32xf32>
    %74 = arith.addf %72, %73 : vector<8x32xf32>
    %75 = math.tanh %74 : vector<8x32xf32>
    %76 = arith.mulf %70, %75 : vector<8x32xf32>
    %77 = arith.index_cast %57 : i32 to index
    %c0_24 = arith.constant 0 : index
    %78 = vector.load %arg11[%77, %c0_24] : memref<64x32xf32, #tpu.memory_space<vmem>>, vector<8x32xf32>
    tpu.vector_store %arg11[%77, %c0_24], %76 {strides = array<i32>} : memref<64x32xf32, #tpu.memory_space<vmem>>, vector<8x32xf32>,
    %c3_i32 = arith.constant 3 : i32
    %c8_i32_25 = arith.constant 8 : i32
    %79 = arith.muli %c3_i32, %c8_i32_25 : i32
    %80 = tpu.assume_multiple %79, 8 : i32
    %81 = arith.index_cast %80 : i32 to index
    %c0_26 = arith.constant 0 : index
    %82 = vector.load %arg10[%81, %c0_26] : memref<64x128xf32, #tpu.memory_space<vmem>>, vector<8x128xf32>
    %cst_27 = arith.constant dense<0.000000e+00> : vector<8x128xf32>
    %83 = tpu.matmul %76, %7, %cst_27 {dimension_numbers = #tpu.dot_dimension_numbers<[1], [0], [0], [1], [0, 0, 1, 1], [], []>} : vector<8x32xf32>, vector<32x128xf32>, vector<8x128xf32> -> vector<8x128xf32>
    %84 = arith.addf %82, %83 : vector<8x128xf32>
    %85 = arith.negf %84 : vector<8x128xf32>
    %86 = math.exp %85 : vector<8x128xf32>
    %cst_28 = arith.constant 1.000000e+00 : f32
    %87 = vector.broadcast %cst_28 : f32 to vector<8x128xf32>
    %88 = arith.addf %87, %86 : vector<8x128xf32>
    %89 = arith.divf %87, %88 : vector<8x128xf32>
    %90 = math.tanh %84 : vector<8x128xf32>
    %91 = vector.extract_strided_slice %89 {offsets = [0, 0], sizes = [8, 32], strides = [1, 1]} : vector<8x128xf32> to vector<8x32xf32>
    %92 = vector.extract_strided_slice %89 {offsets = [0, 32], sizes = [8, 32], strides = [1, 1]} : vector<8x128xf32> to vector<8x32xf32>
    %93 = vector.extract_strided_slice %89 {offsets = [0, 96], sizes = [8, 32], strides = [1, 1]} : vector<8x128xf32> to vector<8x32xf32>
    %94 = vector.extract_strided_slice %90 {offsets = [0, 64], sizes = [8, 32], strides = [1, 1]} : vector<8x128xf32> to vector<8x32xf32>
    %95 = arith.mulf %92, %74 : vector<8x32xf32>
    %96 = arith.mulf %91, %94 : vector<8x32xf32>
    %97 = arith.addf %95, %96 : vector<8x32xf32>
    %98 = math.tanh %97 : vector<8x32xf32>
    %99 = arith.mulf %93, %98 : vector<8x32xf32>
    %100 = arith.index_cast %80 : i32 to index
    %c0_29 = arith.constant 0 : index
    %101 = vector.load %arg11[%100, %c0_29] : memref<64x32xf32, #tpu.memory_space<vmem>>, vector<8x32xf32>
    tpu.vector_store %arg11[%100, %c0_29], %99 {strides = array<i32>} : memref<64x32xf32, #tpu.memory_space<vmem>>, vector<8x32xf32>,
    %c4_i32 = arith.constant 4 : i32
    %c8_i32_30 = arith.constant 8 : i32
    %102 = arith.muli %c4_i32, %c8_i32_30 : i32
    %103 = tpu.assume_multiple %102, 8 : i32
    %104 = arith.index_cast %103 : i32 to index
    %c0_31 = arith.constant 0 : index
    %105 = vector.load %arg10[%104, %c0_31] : memref<64x128xf32, #tpu.memory_space<vmem>>, vector<8x128xf32>
    %cst_32 = arith.constant dense<0.000000e+00> : vector<8x128xf32>
    %106 = tpu.matmul %99, %7, %cst_32 {dimension_numbers = #tpu.dot_dimension_numbers<[1], [0], [0], [1], [0, 0, 1, 1], [], []>} : vector<8x32xf32>, vector<32x128xf32>, vector<8x128xf32> -> vector<8x128xf32>
    %107 = arith.addf %105, %106 : vector<8x128xf32>
    %108 = arith.negf %107 : vector<8x128xf32>
    %109 = math.exp %108 : vector<8x128xf32>
    %cst_33 = arith.constant 1.000000e+00 : f32
    %110 = vector.broadcast %cst_33 : f32 to vector<8x128xf32>
    %111 = arith.addf %110, %109 : vector<8x128xf32>
    %112 = arith.divf %110, %111 : vector<8x128xf32>
    %113 = math.tanh %107 : vector<8x128xf32>
    %114 = vector.extract_strided_slice %112 {offsets = [0, 0], sizes = [8, 32], strides = [1, 1]} : vector<8x128xf32> to vector<8x32xf32>
    %115 = vector.extract_strided_slice %112 {offsets = [0, 32], sizes = [8, 32], strides = [1, 1]} : vector<8x128xf32> to vector<8x32xf32>
    %116 = vector.extract_strided_slice %112 {offsets = [0, 96], sizes = [8, 32], strides = [1, 1]} : vector<8x128xf32> to vector<8x32xf32>
    %117 = vector.extract_strided_slice %113 {offsets = [0, 64], sizes = [8, 32], strides = [1, 1]} : vector<8x128xf32> to vector<8x32xf32>
    %118 = arith.mulf %115, %97 : vector<8x32xf32>
    %119 = arith.mulf %114, %117 : vector<8x32xf32>
    %120 = arith.addf %118, %119 : vector<8x32xf32>
    %121 = math.tanh %120 : vector<8x32xf32>
    %122 = arith.mulf %116, %121 : vector<8x32xf32>
    %123 = arith.index_cast %103 : i32 to index
    %c0_34 = arith.constant 0 : index
    %124 = vector.load %arg11[%123, %c0_34] : memref<64x32xf32, #tpu.memory_space<vmem>>, vector<8x32xf32>
    tpu.vector_store %arg11[%123, %c0_34], %122 {strides = array<i32>} : memref<64x32xf32, #tpu.memory_space<vmem>>, vector<8x32xf32>,
    %c5_i32 = arith.constant 5 : i32
    %c8_i32_35 = arith.constant 8 : i32
    %125 = arith.muli %c5_i32, %c8_i32_35 : i32
    %126 = tpu.assume_multiple %125, 8 : i32
    %127 = arith.index_cast %126 : i32 to index
    %c0_36 = arith.constant 0 : index
    %128 = vector.load %arg10[%127, %c0_36] : memref<64x128xf32, #tpu.memory_space<vmem>>, vector<8x128xf32>
    %cst_37 = arith.constant dense<0.000000e+00> : vector<8x128xf32>
    %129 = tpu.matmul %122, %7, %cst_37 {dimension_numbers = #tpu.dot_dimension_numbers<[1], [0], [0], [1], [0, 0, 1, 1], [], []>} : vector<8x32xf32>, vector<32x128xf32>, vector<8x128xf32> -> vector<8x128xf32>
    %130 = arith.addf %128, %129 : vector<8x128xf32>
    %131 = arith.negf %130 : vector<8x128xf32>
    %132 = math.exp %131 : vector<8x128xf32>
    %cst_38 = arith.constant 1.000000e+00 : f32
    %133 = vector.broadcast %cst_38 : f32 to vector<8x128xf32>
    %134 = arith.addf %133, %132 : vector<8x128xf32>
    %135 = arith.divf %133, %134 : vector<8x128xf32>
    %136 = math.tanh %130 : vector<8x128xf32>
    %137 = vector.extract_strided_slice %135 {offsets = [0, 0], sizes = [8, 32], strides = [1, 1]} : vector<8x128xf32> to vector<8x32xf32>
    %138 = vector.extract_strided_slice %135 {offsets = [0, 32], sizes = [8, 32], strides = [1, 1]} : vector<8x128xf32> to vector<8x32xf32>
    %139 = vector.extract_strided_slice %135 {offsets = [0, 96], sizes = [8, 32], strides = [1, 1]} : vector<8x128xf32> to vector<8x32xf32>
    %140 = vector.extract_strided_slice %136 {offsets = [0, 64], sizes = [8, 32], strides = [1, 1]} : vector<8x128xf32> to vector<8x32xf32>
    %141 = arith.mulf %138, %120 : vector<8x32xf32>
    %142 = arith.mulf %137, %140 : vector<8x32xf32>
    %143 = arith.addf %141, %142 : vector<8x32xf32>
    %144 = math.tanh %143 : vector<8x32xf32>
    %145 = arith.mulf %139, %144 : vector<8x32xf32>
    %146 = arith.index_cast %126 : i32 to index
    %c0_39 = arith.constant 0 : index
    %147 = vector.load %arg11[%146, %c0_39] : memref<64x32xf32, #tpu.memory_space<vmem>>, vector<8x32xf32>
    tpu.vector_store %arg11[%146, %c0_39], %145 {strides = array<i32>} : memref<64x32xf32, #tpu.memory_space<vmem>>, vector<8x32xf32>,
    %c6_i32 = arith.constant 6 : i32
    %c8_i32_40 = arith.constant 8 : i32
    %148 = arith.muli %c6_i32, %c8_i32_40 : i32
    %149 = tpu.assume_multiple %148, 8 : i32
    %150 = arith.index_cast %149 : i32 to index
    %c0_41 = arith.constant 0 : index
    %151 = vector.load %arg10[%150, %c0_41] : memref<64x128xf32, #tpu.memory_space<vmem>>, vector<8x128xf32>
    %cst_42 = arith.constant dense<0.000000e+00> : vector<8x128xf32>
    %152 = tpu.matmul %145, %7, %cst_42 {dimension_numbers = #tpu.dot_dimension_numbers<[1], [0], [0], [1], [0, 0, 1, 1], [], []>} : vector<8x32xf32>, vector<32x128xf32>, vector<8x128xf32> -> vector<8x128xf32>
    %153 = arith.addf %151, %152 : vector<8x128xf32>
    %154 = arith.negf %153 : vector<8x128xf32>
    %155 = math.exp %154 : vector<8x128xf32>
    %cst_43 = arith.constant 1.000000e+00 : f32
    %156 = vector.broadcast %cst_43 : f32 to vector<8x128xf32>
    %157 = arith.addf %156, %155 : vector<8x128xf32>
    %158 = arith.divf %156, %157 : vector<8x128xf32>
    %159 = math.tanh %153 : vector<8x128xf32>
    %160 = vector.extract_strided_slice %158 {offsets = [0, 0], sizes = [8, 32], strides = [1, 1]} : vector<8x128xf32> to vector<8x32xf32>
    %161 = vector.extract_strided_slice %158 {offsets = [0, 32], sizes = [8, 32], strides = [1, 1]} : vector<8x128xf32> to vector<8x32xf32>
    %162 = vector.extract_strided_slice %158 {offsets = [0, 96], sizes = [8, 32], strides = [1, 1]} : vector<8x128xf32> to vector<8x32xf32>
    %163 = vector.extract_strided_slice %159 {offsets = [0, 64], sizes = [8, 32], strides = [1, 1]} : vector<8x128xf32> to vector<8x32xf32>
    %164 = arith.mulf %161, %143 : vector<8x32xf32>
    %165 = arith.mulf %160, %163 : vector<8x32xf32>
    %166 = arith.addf %164, %165 : vector<8x32xf32>
    %167 = math.tanh %166 : vector<8x32xf32>
    %168 = arith.mulf %162, %167 : vector<8x32xf32>
    %169 = arith.index_cast %149 : i32 to index
    %c0_44 = arith.constant 0 : index
    %170 = vector.load %arg11[%169, %c0_44] : memref<64x32xf32, #tpu.memory_space<vmem>>, vector<8x32xf32>
    tpu.vector_store %arg11[%169, %c0_44], %168 {strides = array<i32>} : memref<64x32xf32, #tpu.memory_space<vmem>>, vector<8x32xf32>,
    %c7_i32 = arith.constant 7 : i32
    %c8_i32_45 = arith.constant 8 : i32
    %171 = arith.muli %c7_i32, %c8_i32_45 : i32
    %172 = tpu.assume_multiple %171, 8 : i32
    %173 = arith.index_cast %172 : i32 to index
    %c0_46 = arith.constant 0 : index
    %174 = vector.load %arg10[%173, %c0_46] : memref<64x128xf32, #tpu.memory_space<vmem>>, vector<8x128xf32>
    %cst_47 = arith.constant dense<0.000000e+00> : vector<8x128xf32>
    %175 = tpu.matmul %168, %7, %cst_47 {dimension_numbers = #tpu.dot_dimension_numbers<[1], [0], [0], [1], [0, 0, 1, 1], [], []>} : vector<8x32xf32>, vector<32x128xf32>, vector<8x128xf32> -> vector<8x128xf32>
    %176 = arith.addf %174, %175 : vector<8x128xf32>
    %177 = arith.negf %176 : vector<8x128xf32>
    %178 = math.exp %177 : vector<8x128xf32>
    %cst_48 = arith.constant 1.000000e+00 : f32
    %179 = vector.broadcast %cst_48 : f32 to vector<8x128xf32>
    %180 = arith.addf %179, %178 : vector<8x128xf32>
    %181 = arith.divf %179, %180 : vector<8x128xf32>
    %182 = math.tanh %176 : vector<8x128xf32>
    %183 = vector.extract_strided_slice %181 {offsets = [0, 0], sizes = [8, 32], strides = [1, 1]} : vector<8x128xf32> to vector<8x32xf32>
    %184 = vector.extract_strided_slice %181 {offsets = [0, 32], sizes = [8, 32], strides = [1, 1]} : vector<8x128xf32> to vector<8x32xf32>
    %185 = vector.extract_strided_slice %181 {offsets = [0, 96], sizes = [8, 32], strides = [1, 1]} : vector<8x128xf32> to vector<8x32xf32>
    %186 = vector.extract_strided_slice %182 {offsets = [0, 64], sizes = [8, 32], strides = [1, 1]} : vector<8x128xf32> to vector<8x32xf32>
    %187 = arith.mulf %184, %166 : vector<8x32xf32>
    %188 = arith.mulf %183, %186 : vector<8x32xf32>
    %189 = arith.addf %187, %188 : vector<8x32xf32>
    %190 = math.tanh %189 : vector<8x32xf32>
    %191 = arith.mulf %185, %190 : vector<8x32xf32>
    %192 = arith.index_cast %172 : i32 to index
    %c0_49 = arith.constant 0 : index
    %193 = vector.load %arg11[%192, %c0_49] : memref<64x32xf32, #tpu.memory_space<vmem>>, vector<8x32xf32>
    tpu.vector_store %arg11[%192, %c0_49], %191 {strides = array<i32>} : memref<64x32xf32, #tpu.memory_space<vmem>>, vector<8x32xf32>,
    %c8_i32_50 = arith.constant 8 : i32
    %c0_51 = arith.constant 0 : index
    %c0_52 = arith.constant 0 : index
    %194 = vector.load %arg11[%c0_51, %c0_52] : memref<64x32xf32, #tpu.memory_space<vmem>>, vector<64x32xf32>
    %c0_53 = arith.constant 0 : index
    %c0_54 = arith.constant 0 : index
    %195 = vector.load %arg4[%c0_53, %c0_54] : memref<32x128xf32, #tpu.memory_space<vmem>>, vector<32x128xf32>
    %cst_55 = arith.constant dense<0.000000e+00> : vector<64x128xf32>
    %196 = tpu.matmul %194, %195, %cst_55 {dimension_numbers = #tpu.dot_dimension_numbers<[1], [0], [0], [1], [0, 0, 1, 1], [], []>} : vector<64x32xf32>, vector<32x128xf32>, vector<64x128xf32> -> vector<64x128xf32>
    %c0_56 = arith.constant 0 : index
    %c0_57 = arith.constant 0 : index
    %197 = vector.load %arg6[%c0_56, %c0_57] : memref<1x128xf32, #tpu.memory_space<vmem>>, vector<1x128xf32>
    %198 = vector.broadcast %197 : vector<1x128xf32> to vector<64x128xf32>
    %199 = arith.addf %196, %198 : vector<64x128xf32>
    %c0_58 = arith.constant 0 : index
    %c0_59 = arith.constant 0 : index
    %200 = vector.load %arg12[%c0_58, %c0_59] : memref<64x128xf32, #tpu.memory_space<vmem>>, vector<64x128xf32>
    tpu.vector_store %arg12[%c0_58, %c0_59], %199 {strides = array<i32>} : memref<64x128xf32, #tpu.memory_space<vmem>>, vector<64x128xf32>,
    %c0_60 = arith.constant 0 : index
    %c0_61 = arith.constant 0 : index
    %201 = vector.load %arg5[%c0_60, %c0_61] : memref<32x128xf32, #tpu.memory_space<vmem>>, vector<32x128xf32>
    %cst_62 = arith.constant 0.000000e+00 : f32
    %202 = vector.broadcast %cst_62 : f32 to vector<8x32xf32>
    %cst_63 = arith.constant 0.000000e+00 : f32
    %203 = vector.broadcast %cst_63 : f32 to vector<8x32xf32>
    %c0_i32_64 = arith.constant 0 : i32
    %c8_i32_65 = arith.constant 8 : i32
    %204 = arith.muli %c0_i32_64, %c8_i32_65 : i32
    %205 = tpu.assume_multiple %204, 8 : i32
    %206 = arith.index_cast %205 : i32 to index
    %c0_66 = arith.constant 0 : index
    %207 = vector.load %arg12[%206, %c0_66] : memref<64x128xf32, #tpu.memory_space<vmem>>, vector<8x128xf32>
    %cst_67 = arith.constant dense<0.000000e+00> : vector<8x128xf32>
    %208 = tpu.matmul %202, %201, %cst_67 {dimension_numbers = #tpu.dot_dimension_numbers<[1], [0], [0], [1], [0, 0, 1, 1], [], []>} : vector<8x32xf32>, vector<32x128xf32>, vector<8x128xf32> -> vector<8x128xf32>
    %209 = arith.addf %207, %208 : vector<8x128xf32>
    %210 = arith.negf %209 : vector<8x128xf32>
    %211 = math.exp %210 : vector<8x128xf32>
    %cst_68 = arith.constant 1.000000e+00 : f32
    %212 = vector.broadcast %cst_68 : f32 to vector<8x128xf32>
    %213 = arith.addf %212, %211 : vector<8x128xf32>
    %214 = arith.divf %212, %213 : vector<8x128xf32>
    %215 = math.tanh %209 : vector<8x128xf32>
    %216 = vector.extract_strided_slice %214 {offsets = [0, 0], sizes = [8, 32], strides = [1, 1]} : vector<8x128xf32> to vector<8x32xf32>
    %217 = vector.extract_strided_slice %214 {offsets = [0, 32], sizes = [8, 32], strides = [1, 1]} : vector<8x128xf32> to vector<8x32xf32>
    %218 = vector.extract_strided_slice %214 {offsets = [0, 96], sizes = [8, 32], strides = [1, 1]} : vector<8x128xf32> to vector<8x32xf32>
    %219 = vector.extract_strided_slice %215 {offsets = [0, 64], sizes = [8, 32], strides = [1, 1]} : vector<8x128xf32> to vector<8x32xf32>
    %220 = arith.mulf %217, %203 : vector<8x32xf32>
    %221 = arith.mulf %216, %219 : vector<8x32xf32>
    %222 = arith.addf %220, %221 : vector<8x32xf32>
    %223 = math.tanh %222 : vector<8x32xf32>
    %224 = arith.mulf %218, %223 : vector<8x32xf32>
    %c1_i32_69 = arith.constant 1 : i32
    %c8_i32_70 = arith.constant 8 : i32
    %225 = arith.muli %c1_i32_69, %c8_i32_70 : i32
    %226 = tpu.assume_multiple %225, 8 : i32
    %227 = arith.index_cast %226 : i32 to index
    %c0_71 = arith.constant 0 : index
    %228 = vector.load %arg12[%227, %c0_71] : memref<64x128xf32, #tpu.memory_space<vmem>>, vector<8x128xf32>
    %cst_72 = arith.constant dense<0.000000e+00> : vector<8x128xf32>
    %229 = tpu.matmul %224, %201, %cst_72 {dimension_numbers = #tpu.dot_dimension_numbers<[1], [0], [0], [1], [0, 0, 1, 1], [], []>} : vector<8x32xf32>, vector<32x128xf32>, vector<8x128xf32> -> vector<8x128xf32>
    %230 = arith.addf %228, %229 : vector<8x128xf32>
    %231 = arith.negf %230 : vector<8x128xf32>
    %232 = math.exp %231 : vector<8x128xf32>
    %cst_73 = arith.constant 1.000000e+00 : f32
    %233 = vector.broadcast %cst_73 : f32 to vector<8x128xf32>
    %234 = arith.addf %233, %232 : vector<8x128xf32>
    %235 = arith.divf %233, %234 : vector<8x128xf32>
    %236 = math.tanh %230 : vector<8x128xf32>
    %237 = vector.extract_strided_slice %235 {offsets = [0, 0], sizes = [8, 32], strides = [1, 1]} : vector<8x128xf32> to vector<8x32xf32>
    %238 = vector.extract_strided_slice %235 {offsets = [0, 32], sizes = [8, 32], strides = [1, 1]} : vector<8x128xf32> to vector<8x32xf32>
    %239 = vector.extract_strided_slice %235 {offsets = [0, 96], sizes = [8, 32], strides = [1, 1]} : vector<8x128xf32> to vector<8x32xf32>
    %240 = vector.extract_strided_slice %236 {offsets = [0, 64], sizes = [8, 32], strides = [1, 1]} : vector<8x128xf32> to vector<8x32xf32>
    %241 = arith.mulf %238, %222 : vector<8x32xf32>
    %242 = arith.mulf %237, %240 : vector<8x32xf32>
    %243 = arith.addf %241, %242 : vector<8x32xf32>
    %244 = math.tanh %243 : vector<8x32xf32>
    %245 = arith.mulf %239, %244 : vector<8x32xf32>
    %c2_i32_74 = arith.constant 2 : i32
    %c8_i32_75 = arith.constant 8 : i32
    %246 = arith.muli %c2_i32_74, %c8_i32_75 : i32
    %247 = tpu.assume_multiple %246, 8 : i32
    %248 = arith.index_cast %247 : i32 to index
    %c0_76 = arith.constant 0 : index
    %249 = vector.load %arg12[%248, %c0_76] : memref<64x128xf32, #tpu.memory_space<vmem>>, vector<8x128xf32>
    %cst_77 = arith.constant dense<0.000000e+00> : vector<8x128xf32>
    %250 = tpu.matmul %245, %201, %cst_77 {dimension_numbers = #tpu.dot_dimension_numbers<[1], [0], [0], [1], [0, 0, 1, 1], [], []>} : vector<8x32xf32>, vector<32x128xf32>, vector<8x128xf32> -> vector<8x128xf32>
    %251 = arith.addf %249, %250 : vector<8x128xf32>
    %252 = arith.negf %251 : vector<8x128xf32>
    %253 = math.exp %252 : vector<8x128xf32>
    %cst_78 = arith.constant 1.000000e+00 : f32
    %254 = vector.broadcast %cst_78 : f32 to vector<8x128xf32>
    %255 = arith.addf %254, %253 : vector<8x128xf32>
    %256 = arith.divf %254, %255 : vector<8x128xf32>
    %257 = math.tanh %251 : vector<8x128xf32>
    %258 = vector.extract_strided_slice %256 {offsets = [0, 0], sizes = [8, 32], strides = [1, 1]} : vector<8x128xf32> to vector<8x32xf32>
    %259 = vector.extract_strided_slice %256 {offsets = [0, 32], sizes = [8, 32], strides = [1, 1]} : vector<8x128xf32> to vector<8x32xf32>
    %260 = vector.extract_strided_slice %256 {offsets = [0, 96], sizes = [8, 32], strides = [1, 1]} : vector<8x128xf32> to vector<8x32xf32>
    %261 = vector.extract_strided_slice %257 {offsets = [0, 64], sizes = [8, 32], strides = [1, 1]} : vector<8x128xf32> to vector<8x32xf32>
    %262 = arith.mulf %259, %243 : vector<8x32xf32>
    %263 = arith.mulf %258, %261 : vector<8x32xf32>
    %264 = arith.addf %262, %263 : vector<8x32xf32>
    %265 = math.tanh %264 : vector<8x32xf32>
    %266 = arith.mulf %260, %265 : vector<8x32xf32>
    %c3_i32_79 = arith.constant 3 : i32
    %c8_i32_80 = arith.constant 8 : i32
    %267 = arith.muli %c3_i32_79, %c8_i32_80 : i32
    %268 = tpu.assume_multiple %267, 8 : i32
    %269 = arith.index_cast %268 : i32 to index
    %c0_81 = arith.constant 0 : index
    %270 = vector.load %arg12[%269, %c0_81] : memref<64x128xf32, #tpu.memory_space<vmem>>, vector<8x128xf32>
    %cst_82 = arith.constant dense<0.000000e+00> : vector<8x128xf32>
    %271 = tpu.matmul %266, %201, %cst_82 {dimension_numbers = #tpu.dot_dimension_numbers<[1], [0], [0], [1], [0, 0, 1, 1], [], []>} : vector<8x32xf32>, vector<32x128xf32>, vector<8x128xf32> -> vector<8x128xf32>
    %272 = arith.addf %270, %271 : vector<8x128xf32>
    %273 = arith.negf %272 : vector<8x128xf32>
    %274 = math.exp %273 : vector<8x128xf32>
    %cst_83 = arith.constant 1.000000e+00 : f32
    %275 = vector.broadcast %cst_83 : f32 to vector<8x128xf32>
    %276 = arith.addf %275, %274 : vector<8x128xf32>
    %277 = arith.divf %275, %276 : vector<8x128xf32>
    %278 = math.tanh %272 : vector<8x128xf32>
    %279 = vector.extract_strided_slice %277 {offsets = [0, 0], sizes = [8, 32], strides = [1, 1]} : vector<8x128xf32> to vector<8x32xf32>
    %280 = vector.extract_strided_slice %277 {offsets = [0, 32], sizes = [8, 32], strides = [1, 1]} : vector<8x128xf32> to vector<8x32xf32>
    %281 = vector.extract_strided_slice %277 {offsets = [0, 96], sizes = [8, 32], strides = [1, 1]} : vector<8x128xf32> to vector<8x32xf32>
    %282 = vector.extract_strided_slice %278 {offsets = [0, 64], sizes = [8, 32], strides = [1, 1]} : vector<8x128xf32> to vector<8x32xf32>
    %283 = arith.mulf %280, %264 : vector<8x32xf32>
    %284 = arith.mulf %279, %282 : vector<8x32xf32>
    %285 = arith.addf %283, %284 : vector<8x32xf32>
    %286 = math.tanh %285 : vector<8x32xf32>
    %287 = arith.mulf %281, %286 : vector<8x32xf32>
    %c4_i32_84 = arith.constant 4 : i32
    %c8_i32_85 = arith.constant 8 : i32
    %288 = arith.muli %c4_i32_84, %c8_i32_85 : i32
    %289 = tpu.assume_multiple %288, 8 : i32
    %290 = arith.index_cast %289 : i32 to index
    %c0_86 = arith.constant 0 : index
    %291 = vector.load %arg12[%290, %c0_86] : memref<64x128xf32, #tpu.memory_space<vmem>>, vector<8x128xf32>
    %cst_87 = arith.constant dense<0.000000e+00> : vector<8x128xf32>
    %292 = tpu.matmul %287, %201, %cst_87 {dimension_numbers = #tpu.dot_dimension_numbers<[1], [0], [0], [1], [0, 0, 1, 1], [], []>} : vector<8x32xf32>, vector<32x128xf32>, vector<8x128xf32> -> vector<8x128xf32>
    %293 = arith.addf %291, %292 : vector<8x128xf32>
    %294 = arith.negf %293 : vector<8x128xf32>
    %295 = math.exp %294 : vector<8x128xf32>
    %cst_88 = arith.constant 1.000000e+00 : f32
    %296 = vector.broadcast %cst_88 : f32 to vector<8x128xf32>
    %297 = arith.addf %296, %295 : vector<8x128xf32>
    %298 = arith.divf %296, %297 : vector<8x128xf32>
    %299 = math.tanh %293 : vector<8x128xf32>
    %300 = vector.extract_strided_slice %298 {offsets = [0, 0], sizes = [8, 32], strides = [1, 1]} : vector<8x128xf32> to vector<8x32xf32>
    %301 = vector.extract_strided_slice %298 {offsets = [0, 32], sizes = [8, 32], strides = [1, 1]} : vector<8x128xf32> to vector<8x32xf32>
    %302 = vector.extract_strided_slice %298 {offsets = [0, 96], sizes = [8, 32], strides = [1, 1]} : vector<8x128xf32> to vector<8x32xf32>
    %303 = vector.extract_strided_slice %299 {offsets = [0, 64], sizes = [8, 32], strides = [1, 1]} : vector<8x128xf32> to vector<8x32xf32>
    %304 = arith.mulf %301, %285 : vector<8x32xf32>
    %305 = arith.mulf %300, %303 : vector<8x32xf32>
    %306 = arith.addf %304, %305 : vector<8x32xf32>
    %307 = math.tanh %306 : vector<8x32xf32>
    %308 = arith.mulf %302, %307 : vector<8x32xf32>
    %c5_i32_89 = arith.constant 5 : i32
    %c8_i32_90 = arith.constant 8 : i32
    %309 = arith.muli %c5_i32_89, %c8_i32_90 : i32
    %310 = tpu.assume_multiple %309, 8 : i32
    %311 = arith.index_cast %310 : i32 to index
    %c0_91 = arith.constant 0 : index
    %312 = vector.load %arg12[%311, %c0_91] : memref<64x128xf32, #tpu.memory_space<vmem>>, vector<8x128xf32>
    %cst_92 = arith.constant dense<0.000000e+00> : vector<8x128xf32>
    %313 = tpu.matmul %308, %201, %cst_92 {dimension_numbers = #tpu.dot_dimension_numbers<[1], [0], [0], [1], [0, 0, 1, 1], [], []>} : vector<8x32xf32>, vector<32x128xf32>, vector<8x128xf32> -> vector<8x128xf32>
    %314 = arith.addf %312, %313 : vector<8x128xf32>
    %315 = arith.negf %314 : vector<8x128xf32>
    %316 = math.exp %315 : vector<8x128xf32>
    %cst_93 = arith.constant 1.000000e+00 : f32
    %317 = vector.broadcast %cst_93 : f32 to vector<8x128xf32>
    %318 = arith.addf %317, %316 : vector<8x128xf32>
    %319 = arith.divf %317, %318 : vector<8x128xf32>
    %320 = math.tanh %314 : vector<8x128xf32>
    %321 = vector.extract_strided_slice %319 {offsets = [0, 0], sizes = [8, 32], strides = [1, 1]} : vector<8x128xf32> to vector<8x32xf32>
    %322 = vector.extract_strided_slice %319 {offsets = [0, 32], sizes = [8, 32], strides = [1, 1]} : vector<8x128xf32> to vector<8x32xf32>
    %323 = vector.extract_strided_slice %319 {offsets = [0, 96], sizes = [8, 32], strides = [1, 1]} : vector<8x128xf32> to vector<8x32xf32>
    %324 = vector.extract_strided_slice %320 {offsets = [0, 64], sizes = [8, 32], strides = [1, 1]} : vector<8x128xf32> to vector<8x32xf32>
    %325 = arith.mulf %322, %306 : vector<8x32xf32>
    %326 = arith.mulf %321, %324 : vector<8x32xf32>
    %327 = arith.addf %325, %326 : vector<8x32xf32>
    %328 = math.tanh %327 : vector<8x32xf32>
    %329 = arith.mulf %323, %328 : vector<8x32xf32>
    %c6_i32_94 = arith.constant 6 : i32
    %c8_i32_95 = arith.constant 8 : i32
    %330 = arith.muli %c6_i32_94, %c8_i32_95 : i32
    %331 = tpu.assume_multiple %330, 8 : i32
    %332 = arith.index_cast %331 : i32 to index
    %c0_96 = arith.constant 0 : index
    %333 = vector.load %arg12[%332, %c0_96] : memref<64x128xf32, #tpu.memory_space<vmem>>, vector<8x128xf32>
    %cst_97 = arith.constant dense<0.000000e+00> : vector<8x128xf32>
    %334 = tpu.matmul %329, %201, %cst_97 {dimension_numbers = #tpu.dot_dimension_numbers<[1], [0], [0], [1], [0, 0, 1, 1], [], []>} : vector<8x32xf32>, vector<32x128xf32>, vector<8x128xf32> -> vector<8x128xf32>
    %335 = arith.addf %333, %334 : vector<8x128xf32>
    %336 = arith.negf %335 : vector<8x128xf32>
    %337 = math.exp %336 : vector<8x128xf32>
    %cst_98 = arith.constant 1.000000e+00 : f32
    %338 = vector.broadcast %cst_98 : f32 to vector<8x128xf32>
    %339 = arith.addf %338, %337 : vector<8x128xf32>
    %340 = arith.divf %338, %339 : vector<8x128xf32>
    %341 = math.tanh %335 : vector<8x128xf32>
    %342 = vector.extract_strided_slice %340 {offsets = [0, 0], sizes = [8, 32], strides = [1, 1]} : vector<8x128xf32> to vector<8x32xf32>
    %343 = vector.extract_strided_slice %340 {offsets = [0, 32], sizes = [8, 32], strides = [1, 1]} : vector<8x128xf32> to vector<8x32xf32>
    %344 = vector.extract_strided_slice %340 {offsets = [0, 96], sizes = [8, 32], strides = [1, 1]} : vector<8x128xf32> to vector<8x32xf32>
    %345 = vector.extract_strided_slice %341 {offsets = [0, 64], sizes = [8, 32], strides = [1, 1]} : vector<8x128xf32> to vector<8x32xf32>
    %346 = arith.mulf %343, %327 : vector<8x32xf32>
    %347 = arith.mulf %342, %345 : vector<8x32xf32>
    %348 = arith.addf %346, %347 : vector<8x32xf32>
    %349 = math.tanh %348 : vector<8x32xf32>
    %350 = arith.mulf %344, %349 : vector<8x32xf32>
    %c7_i32_99 = arith.constant 7 : i32
    %c8_i32_100 = arith.constant 8 : i32
    %351 = arith.muli %c7_i32_99, %c8_i32_100 : i32
    %352 = tpu.assume_multiple %351, 8 : i32
    %353 = arith.index_cast %352 : i32 to index
    %c0_101 = arith.constant 0 : index
    %354 = vector.load %arg12[%353, %c0_101] : memref<64x128xf32, #tpu.memory_space<vmem>>, vector<8x128xf32>
    %cst_102 = arith.constant dense<0.000000e+00> : vector<8x128xf32>
    %355 = tpu.matmul %350, %201, %cst_102 {dimension_numbers = #tpu.dot_dimension_numbers<[1], [0], [0], [1], [0, 0, 1, 1], [], []>} : vector<8x32xf32>, vector<32x128xf32>, vector<8x128xf32> -> vector<8x128xf32>
    %356 = arith.addf %354, %355 : vector<8x128xf32>
    %357 = arith.negf %356 : vector<8x128xf32>
    %358 = math.exp %357 : vector<8x128xf32>
    %cst_103 = arith.constant 1.000000e+00 : f32
    %359 = vector.broadcast %cst_103 : f32 to vector<8x128xf32>
    %360 = arith.addf %359, %358 : vector<8x128xf32>
    %361 = arith.divf %359, %360 : vector<8x128xf32>
    %362 = math.tanh %356 : vector<8x128xf32>
    %363 = vector.extract_strided_slice %361 {offsets = [0, 0], sizes = [8, 32], strides = [1, 1]} : vector<8x128xf32> to vector<8x32xf32>
    %364 = vector.extract_strided_slice %361 {offsets = [0, 32], sizes = [8, 32], strides = [1, 1]} : vector<8x128xf32> to vector<8x32xf32>
    %365 = vector.extract_strided_slice %361 {offsets = [0, 96], sizes = [8, 32], strides = [1, 1]} : vector<8x128xf32> to vector<8x32xf32>
    %366 = vector.extract_strided_slice %362 {offsets = [0, 64], sizes = [8, 32], strides = [1, 1]} : vector<8x128xf32> to vector<8x32xf32>
    %367 = arith.mulf %364, %348 : vector<8x32xf32>
    %368 = arith.mulf %363, %366 : vector<8x32xf32>
    %369 = arith.addf %367, %368 : vector<8x32xf32>
    %370 = math.tanh %369 : vector<8x32xf32>
    %371 = arith.mulf %365, %370 : vector<8x32xf32>
    %c8_i32_104 = arith.constant 8 : i32
    %c0_105 = arith.constant 0 : index
    %c0_106 = arith.constant 0 : index
    %372 = vector.load %arg7[%c0_105, %c0_106] : memref<32x2xf32, #tpu.memory_space<vmem>>, vector<32x2xf32>
    %cst_107 = arith.constant dense<0.000000e+00> : vector<8x2xf32>
    %373 = tpu.matmul %371, %372, %cst_107 {dimension_numbers = #tpu.dot_dimension_numbers<[1], [0], [0], [1], [0, 0, 1, 1], [], []>} : vector<8x32xf32>, vector<32x2xf32>, vector<8x2xf32> -> vector<8x2xf32>
    %c0_108 = arith.constant 0 : index
    %c0_109 = arith.constant 0 : index
    %374 = vector.load %arg8[%c0_108, %c0_109] : memref<1x2xf32, #tpu.memory_space<vmem>>, vector<1x2xf32>
    %375 = vector.broadcast %374 : vector<1x2xf32> to vector<8x2xf32>
    %376 = arith.addf %373, %375 : vector<8x2xf32>
    %c0_110 = arith.constant 0 : index
    %c0_111 = arith.constant 0 : index
    %377 = vector.load %arg9[%c0_110, %c0_111] : memref<8x2xf32, #tpu.memory_space<vmem>>, vector<8x2xf32>
    tpu.vector_store %arg9[%c0_110, %c0_111], %376 {strides = array<i32>} : memref<8x2xf32, #tpu.memory_space<vmem>>, vector<8x2xf32>,
    return
  }
}

</mosaic_0001>

<bundles_post_ra>
// kernel: tpu_custom_call.1
= control target key start
LH: loop header
LB: loop body
LE: loop exit
PB: predicated region body
PF: predicated region fallthrough
CT: control target
= control target key end

     0   :  { %vm70_vm0 = vcmask 1042432   ;;  %vm45_vm1 = vcmask 23552   ;;  %v1500_v6 = vmov 0.0   ;;  %s1501_s21 = smov 64   ;;  %s1502_s22 = smov 32   ;;  %vm128_vm6 = vcmask 261120   ;;  %s1868_s2 = inlined_call_operand.vmem [shape: f32[32,128], index: 2, kind: input, shape index: {}]   ;;  %s1869_s1 = inlined_call_operand.vmem [shape: f32[3,128], index: 1, kind: input, shape index: {}]   ;;  %s1870_s0 = inlined_call_operand.vmem [shape: f32[64,3], index: 0, kind: input, shape index: {}]   ;;  %s1871_s3 = inlined_call_operand.vmem [shape: f32[1,128], index: 3, kind: input, shape index: {}]   ;;  %s1872_s4 = inlined_call_operand.vmem [shape: f32[32,128], index: 4, kind: input, shape index: {}]   ;;  %s1873_s6 = inlined_call_operand.vmem [shape: f32[1,128], index: 6, kind: input, shape index: {}]   ;;  %s1874_s5 = inlined_call_operand.vmem [shape: f32[32,128], index: 5, kind: input, shape index: {}]   ;;  %s1875_s7 = inlined_call_operand.vmem [shape: f32[32,2], index: 7, kind: input, shape index: {}]   ;;  %s1876_s8 = inlined_call_operand.vmem [shape: f32[1,2], index: 8, kind: input, shape index: {}]   ;;  %s1877_s9 = inlined_call_operand.vmem [shape: f32[8,2], index: 9, kind: output, shape index: {}]  }
   0x1   :  { %v1556_v0 = vld [vmem:[%s1868_s2 + $0x18] sm:$0xff]  ;;  %v1561_v1 = vld [vmem:[%s1868_s2 + $0x10] sm:$0xff]  ;;  %v40_v2 = vld [vmem:[%s1869_s1] sm:$0x7] }
   0x2   :  { %144 = vmatpush.msra.mxu1 %v1556_v0  ;;  %1317 = vmatpush.msk.msra.mxu0 %vm70_vm0, %v40_v2  ;;  %v32_v3 = vld [vmem:[%s1870_s0] sm:$0xff]  ;;  %v1573_v4 = vld [vmem:[%s1868_s2 + $0x8] sm:$0xff]  ;;  %v682_v34 = vld [vmem:[%s1872_s4 + $0x18] sm:$0xff] }
   0x3   :  { %1318 = vmatmul.msk.f32.vlgmr.msra.gmra.mxu0 %vm45_vm1, %v32_v3  ;;  %211 = vmatpush.msra.mxu2 %v1556_v0  ;;  %v1582_v5 = vld [vmem:[%s1868_s2] sm:$0xff]  ;;  %v681_v35 = vld [vmem:[%s1872_s4 + $0x10] sm:$0xff]  ;;  %v33_v36 = vld [vmem:[%s1870_s0 + $0x8] sm:$0xff] }
   0x4   :  { %145 = vmatpush.msra.mxu1 %v1561_v1  ;;  %483 = vmatpush.msrb.mxu0 %v1556_v0  ;;  %v1608_v7 = vld [vmem:[%s1871_s3] ss:$0 sm:$0xff]  ;;  %v680_v37 = vld [vmem:[%s1872_s4 + $0x8] sm:$0xff] }
   0x5   :  { %212 = vmatpush.msra.mxu2 %v1561_v1  ;;  %723 = vmatpush.msra.mxu3 %v682_v34  ;;  %v679_v38 = vld [vmem:[%s1872_s4] sm:$0xff] }
   0x6   :  { %146 = vmatpush.msra.mxu1 %v1573_v4  ;;  %484 = vmatpush.msrb.mxu0 %v1561_v1 }
   0x7   :  { %213 = vmatpush.msra.mxu2 %v1573_v4  ;;  %724 = vmatpush.msra.mxu3 %v681_v35 }
   0x8   :  { %147 = vmatpush.msra.mxu1 %v1582_v5  ;;  %485 = vmatpush.msrb.mxu0 %v1573_v4 }
   0x9   :  { %148 = vmatmul.f32.vlgmr.msra.gmra.mxu1 %v1500_v6  ;;  %214 = vmatpush.msra.mxu2 %v1582_v5 }
   0xa   :  { %347 = vmatpush.msrb.mxu1 %v1556_v0  ;;  %486 = vmatpush.msrb.mxu0 %v1582_v5 }
   0xb   :  { %279 = vmatpush.msrb.mxu2 %v1556_v0  ;;  %1319 = vmatmul.msk.f32.gmra.mxu0 %vm45_vm1, %v33_v36 }
   0xc   :  { %348 = vmatpush.msrb.mxu1 %v1561_v1  ;;  %725 = vmatpush.msra.mxu3 %v680_v37 }
   0xd   :  { %280 = vmatpush.msrb.mxu2 %v1561_v1 }
   0xe   :  { %349 = vmatpush.msrb.mxu1 %v1573_v4  ;;  %726 = vmatpush.msra.mxu3 %v679_v38 }
   0xf   :  { %281 = vmatpush.msrb.mxu2 %v1573_v4 }
  0x10   :  { %350 = vmatpush.msrb.mxu1 %v1582_v5 }
  0x11   :  { %282 = vmatpush.msrb.mxu2 %v1582_v5 }
  0x12   :  { %551 = vmatpush.msra.mxu1 %v1556_v0 }
  0x14   :  { %552 = vmatpush.msra.mxu1 %v1561_v1 }
  0x16   :  { %553 = vmatpush.msra.mxu1 %v1573_v4 }
  0x18   :  { %554 = vmatpush.msra.mxu1 %v1582_v5 }
  0x80   :  { %v91_v8 = vpop.f32.mrf.mxu0 }
  0x81   :  { %v92_v9 = vadd.f32 %v1608_v7, %v91_v8 }
  0x86   :  { %v149_v10 = vpop.f32.mrf.mxu1 }
  0x87   :  { %v152_v11 = vadd.f32 %v149_v10, %v92_v9  ;;  %v34_v9 = vld [vmem:[%s1870_s0 + $0x10] sm:$0xff] }
  0x88   :  { %v94_v41 = vpop.f32.mrf.mxu0  ;;  %1320 = vmatmul.msk.f32.gmra.mxu0 %vm45_vm1, %v34_v9 }
  0x89   :  { %1371 = vtanh.f32 %v152_v11  ;;  %v1326_v13 = vmul.f32 -1.442695, %v152_v11  ;;  %v95_v42 = vadd.f32 %v1608_v7, %v94_v41 }
  0x8b   :  { %1373 = vpow2.f32 %v1326_v13 }
  0x8f   :  { %v1372_v12 = vpop.eup %1371 }
  0x90   :  { %175 = vrot.lane.b32.xlu0 %v1372_v12, %s1501_s21 }
  0x91   :  { %v1374_v14 = vpop.eup %1373 }
  0x92   :  { %v156_v15 = vadd.f32 1.0, %v1374_v14 }
  0x94   :  { %1375 = vrcp.f32 %v156_v15  ;;  %v168_v21 = vand.u32 2147483648, %v156_v15  ;;  %vm162_vm3 = vweird.f32 %v156_v15  ;;  %v166_v22 = vand.u32 2147483647, %v156_v15 }
  0x96   :  { %v169_v24 = vor.u32 1.1754944e-38, %v168_v21  ;;  %vm167_vm5 = vcmp.eq.f32.partialorder %v166_v22, 8.507059e+37 }
  0x9a   :  { %v1376_v16 = vpop.eup %1375 }
  0x9b   :  { %v158_v17 = vmul.f32 %v1376_v16, %v156_v15  ;;  %vm163_vm2 = vweird.f32 %v1376_v16 }
  0x9c   :  { %vm164_vm4 = vmor %vm162_vm3, %vm163_vm2 }
  0x9d   :  { %v159_v18 = vsub.f32 1.0, %v158_v17 }
  0x9f   :  { %v160_v19 = vmul.f32 %v1376_v16, %v159_v18 }
  0xa1   :  { %v161_v20 = vadd.f32 %v1376_v16, %v160_v19 }
  0xa3   :  { %v165_v23 = vsel %vm164_vm4, %v1376_v16, %v161_v20 }
  0xa4   :  { %v170_v26 = vsel %vm167_vm5, %v169_v24, %v165_v23 }
  0xa5   :  { %v173_v28 = vmul.f32 0.0, %v170_v26 }
 0x102   :  { %v176_v25 = vpop.permute.xlu0 %175 }
 0x103   :  { %v178_v27 = vmul.f32 %v176_v25, %v170_v26 }
 0x105   :  { %180 = vrot.lane.b32.xlu0 %v178_v27, %s1502_s22  ;;  %v97_v12 = vpop.f32.mrf.mxu0 }
 0x106   :  { %v98_v13 = vadd.f32 %v1608_v7, %v97_v12 }
 0x177   :  { %v181_v29 = vpop.permute.xlu0 %180 }
 0x178   :  { %v183_v30 = vadd.f32 %v181_v29, %v173_v28 }
 0x17a   :  { %1377 = vtanh.f32 %v183_v30 }
 0x180   :  { %v1378_v31 = vpop.eup %1377 }
 0x181   :  { %186 = vrot.lane.b32.xlu1 %v1378_v31, %s1501_s21 }
 0x1f3   :  { %v187_v32 = vpop.permute.xlu1 %186 }
 0x1f4   :  { %v189_v33 = vmul.f32 %v187_v32, %v170_v26  ;;  %v35_v32 = vld [vmem:[%s1870_s0 + $0x18] sm:$0xff] }
 0x1f5   :  { %1321 = vmatmul.msk.f32.gmra.mxu0 %vm45_vm1, %v35_v32 }
 0x1f6   :  { %191 = vrot.lane.b32.xlu1 %v189_v33, %s1502_s22 }
 0x268   :  { %v192_v39 = vpop.permute.xlu1 %191 }
 0x269   :  { %194 = vst.msk [vmem:[#allocation3] sm:$0xff] %vm128_vm6, %v192_v39  ;;  %1327 = vmatmul.msk.f32.vlgmr.msra.gmra.mxu2 %vm128_vm6, %v192_v39 }
 0x26a   :  { %415 = vmatpush.msra.mxu2 %v1556_v0 }
 0x26c   :  { %416 = vmatpush.msra.mxu2 %v1561_v1 }
 0x26e   :  { %417 = vmatpush.msra.mxu2 %v1573_v4 }
 0x270   :  { %v671_v40 = vld [vmem:[#allocation3] sm:$0xff]  ;;  %418 = vmatpush.msra.mxu2 %v1582_v5 }
 0x271   :  { %1341 = vmatmul.msk.f32.vlgmr.msra.gmra.mxu3 %vm128_vm6, %v671_v40 }
 0x272   :  { %v100_v37 = vpop.f32.mrf.mxu0 }
 0x273   :  { %v101_v38 = vadd.f32 %v1608_v7, %v100_v37 }
 0x2ec   :  { %v216_v43 = vpop.f32.mrf.mxu2 }
 0x2ed   :  { %v219_v44 = vadd.f32 %v216_v43, %v95_v42 }
 0x2ef   :  { %1379 = vtanh.f32 %v219_v44  ;;  %v1328_v46 = vmul.f32 -1.442695, %v219_v44 }
 0x2f1   :  { %1381 = vpow2.f32 %v1328_v46 }
 0x2f5   :  { %v1380_v45 = vpop.eup %1379 }
 0x2f6   :  { %242 = vrot.lane.b32.xlu2 %v1380_v45, %s1501_s21 }
 0x2f7   :  { %v1382_v47 = vpop.eup %1381 }
 0x2f8   :  { %v223_v48 = vadd.f32 1.0, %v1382_v47 }
 0x2fa   :  { %1383 = vrcp.f32 %v223_v48  ;;  %v235_v54 = vand.u32 2147483648, %v223_v48  ;;  %vm229_vm8 = vweird.f32 %v223_v48  ;;  %v233_v55 = vand.u32 2147483647, %v223_v48 }
 0x2fc   :  { %v236_v57 = vor.u32 1.1754944e-38, %v235_v54  ;;  %vm234_vm10 = vcmp.eq.f32.partialorder %v233_v55, 8.507059e+37 }
 0x300   :  { %v1384_v49 = vpop.eup %1383 }
 0x301   :  { %v225_v50 = vmul.f32 %v1384_v49, %v223_v48  ;;  %vm230_vm7 = vweird.f32 %v1384_v49 }
 0x302   :  { %vm231_vm9 = vmor %vm229_vm8, %vm230_vm7 }
 0x303   :  { %v226_v51 = vsub.f32 1.0, %v225_v50 }
 0x305   :  { %v227_v52 = vmul.f32 %v1384_v49, %v226_v51 }
 0x307   :  { %v228_v53 = vadd.f32 %v1384_v49, %v227_v52 }
 0x309   :  { %v232_v56 = vsel %vm231_vm9, %v1384_v49, %v228_v53 }
 0x30a   :  { %v237_v59 = vsel %vm234_vm10, %v236_v57, %v232_v56 }
 0x30b   :  { %v240_v61 = vmul.f32 %v237_v59, %v183_v30 }
 0x350   :  { %v243_v58 = vpop.permute.xlu2 %242 }
 0x351   :  { %v245_v60 = vmul.f32 %v243_v58, %v237_v59 }
 0x353   :  { %247 = vrot.lane.b32.xlu2 %v245_v60, %s1502_s22 }
 0x3ad   :  { %v248_v62 = vpop.permute.xlu2 %247 }
 0x3ae   :  { %v250_v63 = vadd.f32 %v248_v62, %v240_v61 }
 0x3b0   :  { %1385 = vtanh.f32 %v250_v63 }
 0x3b6   :  { %v1386_v2 = vpop.eup %1385 }
 0x3b7   :  { %253 = vrot.lane.b32.xlu0 %v1386_v2, %s1501_s21 }
 0x429   :  { %v254_v3 = vpop.permute.xlu0 %253 }
 0x42a   :  { %v256_v8 = vmul.f32 %v254_v3, %v237_v59 }
 0x42c   :  { %258 = vrot.lane.b32.xlu1 %v256_v8, %s1502_s22 }
 0x49e   :  { %v259_v10 = vpop.permute.xlu1 %258 }
 0x49f   :  { %262 = vst.msk [vmem:[#allocation3 + $0x8] sm:$0xff] %vm128_vm6, %v259_v10  ;;  %1329 = vmatmul.msk.f32.vlgmr.msrb.gmra.mxu2 %vm128_vm6, %v259_v10 }
 0x4a0   :  { %619 = vmatpush.msrb.mxu2 %v1556_v0 }
 0x4a2   :  { %620 = vmatpush.msrb.mxu2 %v1561_v1 }
 0x4a4   :  { %621 = vmatpush.msrb.mxu2 %v1573_v4 }
 0x4a6   :  { %v672_v11 = vld [vmem:[#allocation3 + $0x8] sm:$0xff]  ;;  %622 = vmatpush.msrb.mxu2 %v1582_v5 }
 0x4a7   :  { %1342 = vmatmul.msk.f32.gmra.mxu3 %vm128_vm6, %v672_v11 }
 0x522   :  { %v284_v14 = vpop.f32.mrf.mxu2 }
 0x523   :  { %v287_v15 = vadd.f32 %v284_v14, %v98_v13 }
 0x525   :  { %1387 = vtanh.f32 %v287_v15  ;;  %v1330_v17 = vmul.f32 -1.442695, %v287_v15 }
 0x527   :  { %1389 = vpow2.f32 %v1330_v17 }
 0x52b   :  { %v1388_v16 = vpop.eup %1387 }
 0x52c   :  { %310 = vrot.lane.b32.xlu2 %v1388_v16, %s1501_s21 }
 0x52d   :  { %v1390_v0 = vpop.eup %1389 }
 0x52e   :  { %v291_v1 = vadd.f32 1.0, %v1390_v0 }
 0x530   :  { %1391 = vrcp.f32 %v291_v1  ;;  %v303_v21 = vand.u32 2147483648, %v291_v1  ;;  %vm297_vm12 = vweird.f32 %v291_v1  ;;  %v301_v22 = vand.u32 2147483647, %v291_v1 }
 0x532   :  { %v304_v24 = vor.u32 1.1754944e-38, %v303_v21  ;;  %vm302_vm14 = vcmp.eq.f32.partialorder %v301_v22, 8.507059e+37 }
 0x536   :  { %v1392_v4 = vpop.eup %1391 }
 0x537   :  { %v293_v18 = vmul.f32 %v1392_v4, %v291_v1  ;;  %vm298_vm11 = vweird.f32 %v1392_v4 }
 0x538   :  { %vm299_vm13 = vmor %vm297_vm12, %vm298_vm11 }
 0x539   :  { %v294_v19 = vsub.f32 1.0, %v293_v18 }
 0x53b   :  { %v295_v5 = vmul.f32 %v1392_v4, %v294_v19 }
 0x53d   :  { %v296_v20 = vadd.f32 %v1392_v4, %v295_v5 }
 0x53f   :  { %v300_v23 = vsel %vm299_vm13, %v1392_v4, %v296_v20 }
 0x540   :  { %v305_v26 = vsel %vm302_vm14, %v304_v24, %v300_v23 }
 0x541   :  { %v308_v28 = vmul.f32 %v305_v26, %v250_v63  ;;  %v36_v63 = vld [vmem:[%s1870_s0 + $0x20] sm:$0xff] }
 0x542   :  { %1322 = vmatmul.msk.f32.gmra.mxu0 %vm45_vm1, %v36_v63  ;;  %v1713_v63 = vld [vmem:[%s1874_s5 + $0x18] sm:$0xff] }
 0x586   :  { %v311_v25 = vpop.permute.xlu2 %310 }
 0x587   :  { %v313_v27 = vmul.f32 %v311_v25, %v305_v26 }
 0x589   :  { %315 = vrot.lane.b32.xlu0 %v313_v27, %s1502_s22 }
 0x5bf   :  { %v103_v8 = vpop.f32.mrf.mxu0 }
 0x5c0   :  { %v104_v9 = vadd.f32 %v1608_v7, %v103_v8  ;;  %v1732_v8 = vld [vmem:[%s1874_s5] sm:$0xff] }
 0x5fb   :  { %v316_v29 = vpop.permute.xlu0 %315 }
 0x5fc   :  { %v318_v30 = vadd.f32 %v316_v29, %v308_v28  ;;  %v37_v28 = vld [vmem:[%s1870_s0 + $0x28] sm:$0xff]  ;;  %v38_v29 = vld [vmem:[%s1870_s0 + $0x30] sm:$0xff] }
 0x5fd   :  { %1323 = vmatmul.msk.f32.gmra.mxu0 %vm45_vm1, %v37_v28 }
 0x5fe   :  { %1393 = vtanh.f32 %v318_v30 }
 0x604   :  { %v1394_v31 = vpop.eup %1393 }
 0x605   :  { %321 = vrot.lane.b32.xlu1 %v1394_v31, %s1501_s21  ;;  %1324 = vmatmul.msk.f32.gmra.mxu0 %vm45_vm1, %v38_v29 }
 0x677   :  { %v322_v33 = vpop.permute.xlu1 %321 }
 0x678   :  { %v324_v34 = vmul.f32 %v322_v33, %v305_v26 }
 0x67a   :  { %326 = vrot.lane.b32.xlu2 %v324_v34, %s1502_s22 }
 0x6d4   :  { %v327_v35 = vpop.permute.xlu2 %326 }
 0x6d5   :  { %330 = vst.msk [vmem:[#allocation3 + $0x10] sm:$0xff] %vm128_vm6, %v327_v35  ;;  %1331 = vmatmul.msk.f32.vlgmr.msrb.gmra.mxu1 %vm128_vm6, %v327_v35  ;;  %v106_v35 = vpop.f32.mrf.mxu0 }
 0x6d6   :  { %777 = vmatpush.msrb.mxu1 %v1713_v63 }
 0x6dc   :  { %v673_v36 = vld [vmem:[#allocation3 + $0x10] sm:$0xff] }
 0x6dd   :  { %1343 = vmatmul.msk.f32.gmra.mxu3 %vm128_vm6, %v673_v36  ;;  %v1698_v36 = vpop.f32.mrf.mxu0 }
 0x752   :  { %v352_v39 = vpop.f32.mrf.mxu1 }
 0x753   :  { %v355_v40 = vadd.f32 %v352_v39, %v101_v38  ;;  %v107_v38 = vadd.f32 %v1608_v7, %v106_v35 }
 0x755   :  { %1395 = vtanh.f32 %v355_v40  ;;  %v1332_v42 = vmul.f32 -1.442695, %v355_v40 }
 0x757   :  { %1397 = vpow2.f32 %v1332_v42 }
 0x75b   :  { %v1396_v41 = vpop.eup %1395 }
 0x75c   :  { %378 = vrot.lane.b32.xlu0 %v1396_v41, %s1501_s21 }
 0x75d   :  { %v1398_v43 = vpop.eup %1397 }
 0x75e   :  { %v359_v44 = vadd.f32 1.0, %v1398_v43 }
 0x760   :  { %1399 = vrcp.f32 %v359_v44  ;;  %v371_v50 = vand.u32 2147483648, %v359_v44  ;;  %vm365_vm0 = vweird.f32 %v359_v44  ;;  %v369_v51 = vand.u32 2147483647, %v359_v44 }
 0x762   :  { %v372_v53 = vor.u32 1.1754944e-38, %v371_v50  ;;  %vm370_vm3 = vcmp.eq.f32.partialorder %v369_v51, 8.507059e+37 }
 0x766   :  { %v1400_v45 = vpop.eup %1399 }
 0x767   :  { %v361_v46 = vmul.f32 %v1400_v45, %v359_v44  ;;  %vm366_vm15 = vweird.f32 %v1400_v45 }
 0x768   :  { %vm367_vm2 = vmor %vm365_vm0, %vm366_vm15 }
 0x769   :  { %v362_v47 = vsub.f32 1.0, %v361_v46 }
 0x76b   :  { %v363_v48 = vmul.f32 %v1400_v45, %v362_v47 }
 0x76d   :  { %v364_v49 = vadd.f32 %v1400_v45, %v363_v48 }
 0x76f   :  { %v368_v52 = vsel %vm367_vm2, %v1400_v45, %v364_v49 }
 0x770   :  { %v373_v55 = vsel %vm370_vm3, %v372_v53, %v368_v52 }
 0x771   :  { %v376_v57 = vmul.f32 %v373_v55, %v318_v30  ;;  %v39_v30 = vld [vmem:[%s1870_s0 + $0x38] sm:$0xff] }
 0x772   :  { %1325 = vmatmul.msk.f32.gmra.mxu0 %vm45_vm1, %v39_v30 }
 0x7ce   :  { %v379_v54 = vpop.permute.xlu0 %378 }
 0x7cf   :  { %v381_v56 = vmul.f32 %v379_v54, %v373_v55 }
 0x7d1   :  { %383 = vrot.lane.b32.xlu1 %v381_v56, %s1502_s22 }
 0x7ef   :  { %v1700_v37 = vpop.f32.mrf.mxu0 }
 0x843   :  { %v384_v58 = vpop.permute.xlu1 %383 }
 0x844   :  { %v386_v59 = vadd.f32 %v384_v58, %v376_v57 }
 0x846   :  { %1401 = vtanh.f32 %v386_v59 }
 0x84c   :  { %v1402_v60 = vpop.eup %1401 }
 0x84d   :  { %389 = vrot.lane.b32.xlu2 %v1402_v60, %s1501_s21 }
 0x8a7   :  { %v390_v61 = vpop.permute.xlu2 %389 }
 0x8a8   :  { %v392_v62 = vmul.f32 %v390_v61, %v373_v55 }
 0x8aa   :  { %394 = vrot.lane.b32.xlu0 %v392_v62, %s1502_s22 }
 0x91c   :  { %v395_v2 = vpop.permute.xlu0 %394 }
 0x91d   :  { %398 = vst.msk [vmem:[#allocation3 + $0x18] sm:$0xff] %vm128_vm6, %v395_v2  ;;  %1333 = vmatmul.msk.f32.vlgmr.msra.gmra.mxu2 %vm128_vm6, %v395_v2  ;;  %v1718_v2 = vld [vmem:[%s1874_s5 + $0x10] sm:$0xff] }
 0x91e   :  { %842 = vmatpush.msra.mxu2 %v1713_v63  ;;  %778 = vmatpush.msrb.mxu1 %v1718_v2 }
 0x920   :  { %843 = vmatpush.msra.mxu2 %v1718_v2 }
 0x924   :  { %v674_v3 = vld [vmem:[#allocation3 + $0x18] sm:$0xff] }
 0x925   :  { %1344 = vmatmul.msk.f32.gmra.mxu3 %vm128_vm6, %v674_v3  ;;  %v1725_v3 = vld [vmem:[%s1874_s5 + $0x8] sm:$0xff] }
 0x926   :  { %779 = vmatpush.msrb.mxu1 %v1725_v3  ;;  %844 = vmatpush.msra.mxu2 %v1725_v3 }
 0x928   :  { %780 = vmatpush.msrb.mxu1 %v1732_v8  ;;  %845 = vmatpush.msra.mxu2 %v1732_v8 }
 0x9a0   :  { %v420_v10 = vpop.f32.mrf.mxu2 }
 0x9a1   :  { %v423_v11 = vadd.f32 %v420_v10, %v104_v9 }
 0x9a3   :  { %1403 = vtanh.f32 %v423_v11  ;;  %v1334_v13 = vmul.f32 -1.442695, %v423_v11  ;;  %v110_v11 = vadd.f32 %v1608_v7, %v1698_v36 }
 0x9a5   :  { %1405 = vpow2.f32 %v1334_v13 }
 0x9a9   :  { %v1404_v12 = vpop.eup %1403 }
 0x9aa   :  { %446 = vrot.lane.b32.xlu1 %v1404_v12, %s1501_s21 }
 0x9ab   :  { %v1406_v14 = vpop.eup %1405 }
 0x9ac   :  { %v427_v15 = vadd.f32 1.0, %v1406_v14  ;;  %v1755_v14 = vld [vmem:[%s1873_s6] ss:$0 sm:$0xff] }
 0x9ae   :  { %1407 = vrcp.f32 %v427_v15  ;;  %v439_v18 = vand.u32 2147483648, %v427_v15  ;;  %vm433_vm5 = vweird.f32 %v427_v15  ;;  %v437_v19 = vand.u32 2147483647, %v427_v15 }
 0x9b0   :  { %v440_v20 = vor.u32 1.1754944e-38, %v439_v18  ;;  %vm438_vm8 = vcmp.eq.f32.partialorder %v437_v19, 8.507059e+37 }
 0x9b4   :  { %v1408_v16 = vpop.eup %1407 }
 0x9b5   :  { %v429_v17 = vmul.f32 %v1408_v16, %v427_v15  ;;  %vm434_vm4 = vweird.f32 %v1408_v16 }
 0x9b6   :  { %vm435_vm7 = vmor %vm433_vm5, %vm434_vm4 }
 0x9b7   :  { %v430_v0 = vsub.f32 1.0, %v429_v17 }
 0x9b9   :  { %v431_v1 = vmul.f32 %v1408_v16, %v430_v0 }
 0x9bb   :  { %v432_v4 = vadd.f32 %v1408_v16, %v431_v1 }
 0x9bd   :  { %v436_v5 = vsel %vm435_vm7, %v1408_v16, %v432_v4 }
 0x9be   :  { %v441_v22 = vsel %vm438_vm8, %v440_v20, %v436_v5 }
 0x9bf   :  { %v444_v24 = vmul.f32 %v441_v22, %v386_v59 }
 0xa1c   :  { %v447_v21 = vpop.permute.xlu1 %446 }
 0xa1d   :  { %v449_v23 = vmul.f32 %v447_v21, %v441_v22 }
 0xa1f   :  { %451 = vrot.lane.b32.xlu2 %v449_v23, %s1502_s22 }
 0xa79   :  { %v452_v25 = vpop.permute.xlu2 %451 }
 0xa7a   :  { %v454_v26 = vadd.f32 %v452_v25, %v444_v24 }
 0xa7c   :  { %1409 = vtanh.f32 %v454_v26 }
 0xa82   :  { %v1410_v27 = vpop.eup %1409 }
 0xa83   :  { %457 = vrot.lane.b32.xlu0 %v1410_v27, %s1501_s21 }
 0xaf5   :  { %v458_v31 = vpop.permute.xlu0 %457 }
 0xaf6   :  { %v460_v32 = vmul.f32 %v458_v31, %v441_v22 }
 0xaf8   :  { %462 = vrot.lane.b32.xlu1 %v460_v32, %s1502_s22 }
 0xb6a   :  { %v463_v33 = vpop.permute.xlu1 %462 }
 0xb6b   :  { %466 = vst.msk [vmem:[#allocation3 + $0x20] sm:$0xff] %vm128_vm6, %v463_v33  ;;  %1335 = vmatmul.msk.f32.vlgmr.msrb.gmra.mxu0 %vm128_vm6, %v463_v33 }
 0xb72   :  { %v675_v34 = vld [vmem:[#allocation3 + $0x20] sm:$0xff] }
 0xb73   :  { %1345 = vmatmul.msk.f32.gmra.mxu3 %vm128_vm6, %v675_v34 }
 0xbe8   :  { %v488_v39 = vpop.f32.mrf.mxu0 }
 0xbe9   :  { %v491_v40 = vadd.f32 %v488_v39, %v107_v38 }
 0xbeb   :  { %1411 = vtanh.f32 %v491_v40  ;;  %v1336_v42 = vmul.f32 -1.442695, %v491_v40 }
 0xbed   :  { %1413 = vpow2.f32 %v1336_v42 }
 0xbf1   :  { %v1412_v41 = vpop.eup %1411 }
 0xbf2   :  { %514 = vrot.lane.b32.xlu2 %v1412_v41, %s1501_s21 }
 0xbf3   :  { %v1414_v43 = vpop.eup %1413 }
 0xbf4   :  { %v495_v44 = vadd.f32 1.0, %v1414_v43 }
 0xbf6   :  { %1415 = vrcp.f32 %v495_v44  ;;  %v507_v50 = vand.u32 2147483648, %v495_v44  ;;  %vm501_vm9 = vweird.f32 %v495_v44  ;;  %v505_v51 = vand.u32 2147483647, %v495_v44 }
 0xbf8   :  { %v508_v53 = vor.u32 1.1754944e-38, %v507_v50  ;;  %vm506_vm11 = vcmp.eq.f32.partialorder %v505_v51, 8.507059e+37 }
 0xbfc   :  { %v1416_v45 = vpop.eup %1415 }
 0xbfd   :  { %v497_v46 = vmul.f32 %v1416_v45, %v495_v44  ;;  %vm502_vm1 = vweird.f32 %v1416_v45 }
 0xbfe   :  { %vm503_vm10 = vmor %vm501_vm9, %vm502_vm1 }
 0xbff   :  { %v498_v47 = vsub.f32 1.0, %v497_v46 }
 0xc01   :  { %v499_v48 = vmul.f32 %v1416_v45, %v498_v47 }
 0xc03   :  { %v500_v49 = vadd.f32 %v1416_v45, %v499_v48 }
 0xc05   :  { %v504_v52 = vsel %vm503_vm10, %v1416_v45, %v500_v49 }
 0xc06   :  { %v509_v55 = vsel %vm506_vm11, %v508_v53, %v504_v52 }
 0xc07   :  { %v512_v57 = vmul.f32 %v509_v55, %v454_v26 }
 0xc4c   :  { %v515_v54 = vpop.permute.xlu2 %514 }
 0xc4d   :  { %v517_v56 = vmul.f32 %v515_v54, %v509_v55 }
 0xc4f   :  { %519 = vrot.lane.b32.xlu0 %v517_v56, %s1502_s22 }
 0xcc1   :  { %v520_v58 = vpop.permute.xlu0 %519 }
 0xcc2   :  { %v1705_v59 = vadd.f32 %v520_v58, %v512_v57 }
 0xcc4   :  { %1417 = vtanh.f32 %v1705_v59 }
 0xcca   :  { %v1418_v60 = vpop.eup %1417 }
 0xccb   :  { %525 = vrot.lane.b32.xlu1 %v1418_v60, %s1501_s21 }
 0xd3d   :  { %v526_v61 = vpop.permute.xlu1 %525 }
 0xd3e   :  { %v528_v62 = vmul.f32 %v526_v61, %v509_v55 }
 0xd40   :  { %530 = vrot.lane.b32.xlu2 %v528_v62, %s1502_s22 }
 0xd9a   :  { %v531_v9 = vpop.permute.xlu2 %530 }
 0xd9b   :  { %534 = vst.msk [vmem:[#allocation3 + $0x28] sm:$0xff] %vm128_vm6, %v531_v9  ;;  %1337 = vmatmul.msk.f32.vlgmr.msra.gmra.mxu1 %vm128_vm6, %v531_v9 }
 0xd9c   :  { %907 = vmatpush.msra.mxu1 %v1713_v63 }
 0xd9e   :  { %908 = vmatpush.msra.mxu1 %v1718_v2 }
 0xda0   :  { %909 = vmatpush.msra.mxu1 %v1725_v3 }
 0xda2   :  { %v676_v10 = vld [vmem:[#allocation3 + $0x28] sm:$0xff]  ;;  %910 = vmatpush.msra.mxu1 %v1732_v8 }
 0xda3   :  { %1346 = vmatmul.msk.f32.gmra.mxu3 %vm128_vm6, %v676_v10  ;;  %781 = vmatmul.f32.vlgmr.msrb.gmra.mxu1 %v1500_v6  ;;  %v728_v6 = vpop.f32.mrf.mxu3 }
 0xda4   :  { %1037 = vmatpush.msrb.mxu1 %v1713_v63  ;;  %v729_v15 = vadd.f32 %v1755_v14, %v728_v6 }
 0xda6   :  { %1038 = vmatpush.msrb.mxu1 %v1718_v2 }
 0xda8   :  { %1039 = vmatpush.msrb.mxu1 %v1725_v3 }
 0xdaa   :  { %1040 = vmatpush.msrb.mxu1 %v1732_v8 }
 0xdab   :  { %v731_v62 = vpop.f32.mrf.mxu3 }
 0xdac   :  { %v732_v9 = vadd.f32 %v1755_v14, %v731_v62 }
 0xe18   :  { %v556_v12 = vpop.f32.mrf.mxu1 }
 0xe19   :  { %v559_v13 = vadd.f32 %v556_v12, %v110_v11 }
 0xe1b   :  { %1419 = vtanh.f32 %v559_v13  ;;  %v1338_v7 = vmul.f32 -1.442695, %v559_v13 }
 0xe20   :  { %v782_v16 = vpop.f32.mrf.mxu1 }
 0xe21   :  { %v1420_v17 = vpop.eup %1419  ;;  %v785_v0 = vadd.f32 %v782_v16, %v729_v15 }
 0xe22   :  { %582 = vrot.lane.b32.xlu0 %v1420_v17, %s1501_s21 }
 0xe23   :  { %1421 = vtanh.f32 %v785_v0  ;;  %v1349_v4 = vmul.f32 -1.442695, %v785_v0 }
 0xe24   :  { %1423 = vpow2.f32 %v1338_v7 }
 0xe25   :  { %1425 = vpow2.f32 %v1349_v4 }
 0xe29   :  { %v1422_v1 = vpop.eup %1421 }
 0xe2a   :  { %808 = vrot.lane.b32.xlu1 %v1422_v1, %s1501_s21  ;;  %v1424_v18 = vpop.eup %1423 }
 0xe2b   :  { %v563_v19 = vadd.f32 1.0, %v1424_v18  ;;  %v1426_v5 = vpop.eup %1425 }
 0xe2c   :  { %v789_v20 = vadd.f32 1.0, %v1426_v5 }
 0xe2d   :  { %1427 = vrcp.f32 %v563_v19  ;;  %v575_v29 = vand.u32 2147483648, %v563_v19  ;;  %vm569_vm13 = vweird.f32 %v563_v19  ;;  %v573_v30 = vand.u32 2147483647, %v563_v19 }
 0xe2e   :  { %1429 = vrcp.f32 %v789_v20  ;;  %v801_v39 = vand.u32 2147483648, %v789_v20  ;;  %vm795_vm2 = vweird.f32 %v789_v20  ;;  %v799_v40 = vand.u32 2147483647, %v789_v20 }
 0xe2f   :  { %v576_v33 = vor.u32 1.1754944e-38, %v575_v29  ;;  %vm574_vm15 = vcmp.eq.f32.partialorder %v573_v30, 8.507059e+37  ;;  %v734_v30 = vpop.f32.mrf.mxu3 }
 0xe30   :  { %v802_v42 = vor.u32 1.1754944e-38, %v801_v39  ;;  %vm800_vm4 = vcmp.eq.f32.partialorder %v799_v40, 8.507059e+37 }
 0xe33   :  { %v1428_v21 = vpop.eup %1427 }
 0xe34   :  { %v565_v22 = vmul.f32 %v1428_v21, %v563_v19  ;;  %v1430_v24 = vpop.eup %1429  ;;  %vm570_vm12 = vweird.f32 %v1428_v21 }
 0xe35   :  { %v791_v26 = vmul.f32 %v1430_v24, %v789_v20  ;;  %vm571_vm14 = vmor %vm569_vm13, %vm570_vm12  ;;  %vm796_vm0 = vweird.f32 %v1430_v24 }
 0xe36   :  { %v566_v23 = vsub.f32 1.0, %v565_v22  ;;  %vm797_vm3 = vmor %vm795_vm2, %vm796_vm0 }
 0xe37   :  { %v792_v28 = vsub.f32 1.0, %v791_v26 }
 0xe38   :  { %v567_v25 = vmul.f32 %v1428_v21, %v566_v23 }
 0xe39   :  { %v793_v32 = vmul.f32 %v1430_v24, %v792_v28 }
 0xe3a   :  { %v568_v27 = vadd.f32 %v1428_v21, %v567_v25 }
 0xe3b   :  { %v794_v38 = vadd.f32 %v1430_v24, %v793_v32 }
 0xe3c   :  { %v572_v31 = vsel %vm571_vm14, %v1428_v21, %v568_v27 }
 0xe3d   :  { %v577_v35 = vsel %vm574_vm15, %v576_v33, %v572_v31  ;;  %v798_v41 = vsel %vm797_vm3, %v1430_v24, %v794_v38  ;;  %v735_v31 = vadd.f32 %v1755_v14, %v734_v30 }
 0xe3e   :  { %v803_v44 = vsel %vm800_vm4, %v802_v42, %v798_v41  ;;  %v580_v46 = vmul.f32 %v577_v35, %v1705_v59 }
 0xe3f   :  { %v806_v50 = vmul.f32 0.0, %v803_v44 }
 0xe94   :  { %v583_v34 = vpop.permute.xlu0 %582 }
 0xe95   :  { %v585_v36 = vmul.f32 %v583_v34, %v577_v35 }
 0xe97   :  { %587 = vrot.lane.b32.xlu2 %v585_v36, %s1502_s22 }
 0xe9c   :  { %v809_v43 = vpop.permute.xlu1 %808 }
 0xe9d   :  { %v811_v45 = vmul.f32 %v809_v43, %v803_v44 }
 0xe9f   :  { %813 = vrot.lane.b32.xlu0 %v811_v45, %s1502_s22 }
 0xef1   :  { %v588_v47 = vpop.permute.xlu2 %587 }
 0xef2   :  { %v1763_v48 = vadd.f32 %v588_v47, %v580_v46 }
 0xef4   :  { %1431 = vtanh.f32 %v1763_v48 }
 0xefa   :  { %v1432_v49 = vpop.eup %1431 }
 0xefb   :  { %593 = vrot.lane.b32.xlu1 %v1432_v49, %s1501_s21 }
 0xf11   :  { %v814_v51 = vpop.permute.xlu0 %813 }
 0xf12   :  { %v816_v52 = vadd.f32 %v814_v51, %v806_v50 }
 0xf14   :  { %1433 = vtanh.f32 %v816_v52 }
 0xf1a   :  { %v1434_v53 = vpop.eup %1433 }
 0xf1b   :  { %819 = vrot.lane.b32.xlu2 %v1434_v53, %s1501_s21 }
 0xf6d   :  { %v594_v54 = vpop.permute.xlu1 %593 }
 0xf6e   :  { %v596_v55 = vmul.f32 %v594_v54, %v577_v35 }
 0xf70   :  { %598 = vrot.lane.b32.xlu0 %v596_v55, %s1502_s22 }
 0xf75   :  { %v820_v56 = vpop.permute.xlu2 %819 }
 0xf76   :  { %v822_v57 = vmul.f32 %v820_v56, %v803_v44 }
 0xf78   :  { %826 = vrot.lane.b32.xlu1 %v822_v57, %s1502_s22 }
 0xfe2   :  { %v599_v58 = vpop.permute.xlu0 %598 }
 0xfe3   :  { %602 = vst.msk [vmem:[#allocation3 + $0x30] sm:$0xff] %vm128_vm6, %v599_v58  ;;  %1339 = vmatmul.msk.f32.vlgmr.msrb.gmra.mxu2 %vm128_vm6, %v599_v58 }
 0xfe4   :  { %972 = vmatpush.msrb.mxu2 %v1713_v63 }
 0xfe6   :  { %973 = vmatpush.msrb.mxu2 %v1718_v2 }
 0xfe8   :  { %974 = vmatpush.msrb.mxu2 %v1725_v3 }
 0xfea   :  { %v827_v59 = vpop.permute.xlu1 %826  ;;  %v677_v60 = vld [vmem:[#allocation3 + $0x30] sm:$0xff]  ;;  %975 = vmatpush.msrb.mxu2 %v1732_v8 }
 0xfeb   :  { %1347 = vmatmul.msk.f32.gmra.mxu3 %vm128_vm6, %v677_v60  ;;  %1350 = vmatmul.msk.f32.vlgmr.msra.gmra.mxu2 %vm128_vm6, %v827_v59  ;;  %v737_v59 = vpop.f32.mrf.mxu3 }
 0xfec   :  { %1102 = vmatpush.msra.mxu2 %v1713_v63  ;;  %v738_v60 = vadd.f32 %v1755_v14, %v737_v59 }
 0xfee   :  { %1103 = vmatpush.msra.mxu2 %v1718_v2 }
 0xff0   :  { %1104 = vmatpush.msra.mxu2 %v1725_v3 }
 0xff2   :  { %1105 = vmatpush.msra.mxu2 %v1732_v8 }
0x1066   :  { %v1782_v61 = vpop.f32.mrf.mxu2 }
0x106e   :  { %v847_v10 = vpop.f32.mrf.mxu2 }
0x106f   :  { %v850_v11 = vadd.f32 %v847_v10, %v732_v9 }
0x1071   :  { %1435 = vtanh.f32 %v850_v11  ;;  %v1351_v13 = vmul.f32 -1.442695, %v850_v11 }
0x1073   :  { %1437 = vpow2.f32 %v1351_v13 }
0x1077   :  { %v1436_v12 = vpop.eup %1435 }
0x1078   :  { %873 = vrot.lane.b32.xlu2 %v1436_v12, %s1501_s21 }
0x1079   :  { %v1438_v6 = vpop.eup %1437 }
0x107a   :  { %v854_v15 = vadd.f32 1.0, %v1438_v6 }
0x107c   :  { %1439 = vrcp.f32 %v854_v15  ;;  %v866_v4 = vand.u32 2147483648, %v854_v15  ;;  %vm860_vm7 = vweird.f32 %v854_v15  ;;  %v864_v18 = vand.u32 2147483647, %v854_v15 }
0x107e   :  { %v867_v5 = vor.u32 1.1754944e-38, %v866_v4  ;;  %vm865_vm1 = vcmp.eq.f32.partialorder %v864_v18, 8.507059e+37 }
0x1082   :  { %v1440_v16 = vpop.eup %1439 }
0x1083   :  { %v856_v17 = vmul.f32 %v1440_v16, %v854_v15  ;;  %vm861_vm5 = vweird.f32 %v1440_v16 }
0x1084   :  { %vm862_vm8 = vmor %vm860_vm7, %vm861_vm5 }
0x1085   :  { %v857_v0 = vsub.f32 1.0, %v856_v17 }
0x1087   :  { %v858_v1 = vmul.f32 %v1440_v16, %v857_v0 }
0x1089   :  { %v859_v7 = vadd.f32 %v1440_v16, %v858_v1 }
0x108b   :  { %v863_v19 = vsel %vm862_vm8, %v1440_v16, %v859_v7 }
0x108c   :  { %v868_v21 = vsel %vm865_vm1, %v867_v5, %v863_v19 }
0x108d   :  { %v871_v23 = vmul.f32 %v868_v21, %v816_v52 }
0x10d2   :  { %v874_v20 = vpop.permute.xlu2 %873 }
0x10d3   :  { %v876_v22 = vmul.f32 %v874_v20, %v868_v21 }
0x10d5   :  { %878 = vrot.lane.b32.xlu0 %v876_v22, %s1502_s22 }
0x1147   :  { %v879_v24 = vpop.permute.xlu0 %878 }
0x1148   :  { %v881_v25 = vadd.f32 %v879_v24, %v871_v23  ;;  %v740_v24 = vpop.f32.mrf.mxu3 }
0x114a   :  { %1441 = vtanh.f32 %v881_v25 }
0x1150   :  { %v1442_v26 = vpop.eup %1441 }
0x1151   :  { %884 = vrot.lane.b32.xlu1 %v1442_v26, %s1501_s21 }
0x11c3   :  { %v885_v27 = vpop.permute.xlu1 %884 }
0x11c4   :  { %v887_v28 = vmul.f32 %v885_v27, %v868_v21 }
0x11c6   :  { %891 = vrot.lane.b32.xlu2 %v887_v28, %s1502_s22 }
0x1220   :  { %v892_v29 = vpop.permute.xlu2 %891 }
0x1221   :  { %1352 = vmatmul.msk.f32.vlgmr.msra.gmra.mxu1 %vm128_vm6, %v892_v29 }
0x1222   :  { %1167 = vmatpush.msra.mxu1 %v1713_v63 }
0x1224   :  { %1168 = vmatpush.msra.mxu1 %v1718_v2 }
0x1226   :  { %1169 = vmatpush.msra.mxu1 %v1725_v3 }
0x1228   :  { %1170 = vmatpush.msra.mxu1 %v1732_v8 }
0x129e   :  { %v912_v32 = vpop.f32.mrf.mxu1 }
0x129f   :  { %v915_v33 = vadd.f32 %v912_v32, %v735_v31 }
0x12a1   :  { %1443 = vtanh.f32 %v915_v33  ;;  %v1353_v35 = vmul.f32 -1.442695, %v915_v33 }
0x12a3   :  { %1445 = vpow2.f32 %v1353_v35 }
0x12a7   :  { %v1444_v34 = vpop.eup %1443 }
0x12a8   :  { %938 = vrot.lane.b32.xlu0 %v1444_v34, %s1501_s21 }
0x12a9   :  { %v1446_v36 = vpop.eup %1445 }
0x12aa   :  { %v919_v38 = vadd.f32 1.0, %v1446_v36 }
0x12ac   :  { %1447 = vrcp.f32 %v919_v38  ;;  %v931_v44 = vand.u32 2147483648, %v919_v38  ;;  %vm925_vm10 = vweird.f32 %v919_v38  ;;  %v929_v45 = vand.u32 2147483647, %v919_v38 }
0x12ae   :  { %v932_v47 = vor.u32 1.1754944e-38, %v931_v44  ;;  %vm930_vm12 = vcmp.eq.f32.partialorder %v929_v45, 8.507059e+37 }
0x12b2   :  { %v1448_v39 = vpop.eup %1447 }
0x12b3   :  { %v921_v40 = vmul.f32 %v1448_v39, %v919_v38  ;;  %vm926_vm9 = vweird.f32 %v1448_v39 }
0x12b4   :  { %vm927_vm11 = vmor %vm925_vm10, %vm926_vm9 }
0x12b5   :  { %v922_v41 = vsub.f32 1.0, %v921_v40 }
0x12b7   :  { %v923_v42 = vmul.f32 %v1448_v39, %v922_v41 }
0x12b9   :  { %v924_v43 = vadd.f32 %v1448_v39, %v923_v42 }
0x12bb   :  { %v928_v46 = vsel %vm927_vm11, %v1448_v39, %v924_v43 }
0x12bc   :  { %v933_v50 = vsel %vm930_vm12, %v932_v47, %v928_v46 }
0x12bd   :  { %v936_v52 = vmul.f32 %v933_v50, %v881_v25  ;;  %v741_v25 = vadd.f32 %v1755_v14, %v740_v24 }
0x131a   :  { %v939_v49 = vpop.permute.xlu0 %938 }
0x131b   :  { %v941_v51 = vmul.f32 %v939_v49, %v933_v50 }
0x131d   :  { %943 = vrot.lane.b32.xlu1 %v941_v51, %s1502_s22 }
0x138f   :  { %v944_v53 = vpop.permute.xlu1 %943 }
0x1390   :  { %v946_v54 = vadd.f32 %v944_v53, %v936_v52  ;;  %v743_v53 = vpop.f32.mrf.mxu3 }
0x1392   :  { %1449 = vtanh.f32 %v946_v54 }
0x1398   :  { %v1450_v55 = vpop.eup %1449 }
0x1399   :  { %949 = vrot.lane.b32.xlu2 %v1450_v55, %s1501_s21 }
0x13f3   :  { %v950_v56 = vpop.permute.xlu2 %949 }
0x13f4   :  { %v952_v57 = vmul.f32 %v950_v56, %v933_v50 }
0x13f6   :  { %956 = vrot.lane.b32.xlu0 %v952_v57, %s1502_s22 }
0x1468   :  { %v957_v58 = vpop.permute.xlu0 %956 }
0x1469   :  { %1354 = vmatmul.msk.f32.vlgmr.msrb.gmra.mxu2 %vm128_vm6, %v957_v58 }
0x146a   :  { %1232 = vmatpush.msrb.mxu2 %v1713_v63 }
0x146c   :  { %1233 = vmatpush.msrb.mxu2 %v1718_v2 }
0x146e   :  { %1234 = vmatpush.msrb.mxu2 %v1725_v3 }
0x1470   :  { %1235 = vmatpush.msrb.mxu2 %v1732_v8 }
0x14ec   :  { %v977_v62 = vpop.f32.mrf.mxu2 }
0x14ed   :  { %v980_v9 = vadd.f32 %v977_v62, %v738_v60 }
0x14ef   :  { %1451 = vtanh.f32 %v980_v9  ;;  %v1355_v11 = vmul.f32 -1.442695, %v980_v9 }
0x14f1   :  { %1453 = vpow2.f32 %v1355_v11 }
0x14f5   :  { %v1452_v10 = vpop.eup %1451 }
0x14f6   :  { %1003 = vrot.lane.b32.xlu1 %v1452_v10, %s1501_s21 }
0x14f7   :  { %v1454_v12 = vpop.eup %1453 }
0x14f8   :  { %v984_v13 = vadd.f32 1.0, %v1454_v12 }
0x14fa   :  { %1455 = vrcp.f32 %v984_v13  ;;  %v996_v8 = vand.u32 2147483648, %v984_v13  ;;  %vm990_vm14 = vweird.f32 %v984_v13  ;;  %v994_v16 = vand.u32 2147483647, %v984_v13 }
0x14fc   :  { %v997_v0 = vor.u32 1.1754944e-38, %v996_v8  ;;  %vm995_vm0 = vcmp.eq.f32.partialorder %v994_v16, 8.507059e+37 }
0x1500   :  { %v1456_v63 = vpop.eup %1455 }
0x1501   :  { %v986_v2 = vmul.f32 %v1456_v63, %v984_v13  ;;  %vm991_vm13 = vweird.f32 %v1456_v63 }
0x1502   :  { %vm992_vm15 = vmor %vm990_vm14, %vm991_vm13 }
0x1503   :  { %v987_v6 = vsub.f32 1.0, %v986_v2 }
0x1505   :  { %v988_v3 = vmul.f32 %v1456_v63, %v987_v6  ;;  %v1499_v6 = vld [vmem:[%s1871_s3] ss:$0 sm:$0xff] }
0x1507   :  { %v989_v15 = vadd.f32 %v1456_v63, %v988_v3  ;;  %v113_v3 = vadd.f32 %v1499_v6, %v1700_v37 }
0x1509   :  { %v993_v17 = vsel %vm992_vm15, %v1456_v63, %v989_v15  ;;  %v627_v8 = vadd.f32 %v1782_v61, %v113_v3 }
0x150a   :  { %v998_v7 = vsel %vm995_vm0, %v997_v0, %v993_v17 }
0x150b   :  { %v1001_v18 = vmul.f32 %v998_v7, %v946_v54  ;;  %v744_v54 = vadd.f32 %v1755_v14, %v743_v53 }
0x1568   :  { %v1004_v1 = vpop.permute.xlu1 %1003 }
0x1569   :  { %v1006_v4 = vmul.f32 %v1004_v1, %v998_v7 }
0x156b   :  { %1008 = vrot.lane.b32.xlu2 %v1006_v4, %s1502_s22 }
0x15c5   :  { %v1009_v19 = vpop.permute.xlu2 %1008 }
0x15c6   :  { %v1011_v5 = vadd.f32 %v1009_v19, %v1001_v18  ;;  %v1340_v19 = vmul.f32 -1.442695, %v627_v8 }
0x15c8   :  { %1457 = vtanh.f32 %v1011_v5 }
0x15ce   :  { %v1458_v20 = vpop.eup %1457 }
0x15cf   :  { %1014 = vrot.lane.b32.xlu0 %v1458_v20, %s1501_s21 }
0x1641   :  { %v1015_v21 = vpop.permute.xlu0 %1014 }
0x1642   :  { %v1017_v22 = vmul.f32 %v1015_v21, %v998_v7 }
0x1644   :  { %1021 = vrot.lane.b32.xlu1 %v1017_v22, %s1502_s22 }
0x16b6   :  { %v1022_v23 = vpop.permute.xlu1 %1021 }
0x16b7   :  { %1356 = vmatmul.msk.f32.vlgmr.msrb.gmra.mxu1 %vm128_vm6, %v1022_v23 }
0x1734   :  { %v1042_v26 = vpop.f32.mrf.mxu1 }
0x1735   :  { %v1045_v27 = vadd.f32 %v1042_v26, %v741_v25 }
0x1737   :  { %1459 = vtanh.f32 %v1045_v27  ;;  %v1357_v29 = vmul.f32 -1.442695, %v1045_v27 }
0x1739   :  { %1461 = vpow2.f32 %v1357_v29 }
0x173d   :  { %v1460_v28 = vpop.eup %1459 }
0x173e   :  { %1068 = vrot.lane.b32.xlu2 %v1460_v28, %s1501_s21 }
0x173f   :  { %v1462_v30 = vpop.eup %1461 }
0x1740   :  { %v1049_v31 = vadd.f32 1.0, %v1462_v30 }
0x1742   :  { %1463 = vrcp.f32 %v1049_v31  ;;  %v1061_v38 = vand.u32 2147483648, %v1049_v31  ;;  %vm1055_vm3 = vweird.f32 %v1049_v31  ;;  %v1059_v39 = vand.u32 2147483647, %v1049_v31 }
0x1744   :  { %v1062_v41 = vor.u32 1.1754944e-38, %v1061_v38  ;;  %vm1060_vm5 = vcmp.eq.f32.partialorder %v1059_v39, 8.507059e+37 }
0x1748   :  { %v1464_v32 = vpop.eup %1463 }
0x1749   :  { %v1051_v33 = vmul.f32 %v1464_v32, %v1049_v31  ;;  %vm1056_vm2 = vweird.f32 %v1464_v32 }
0x174a   :  { %vm1057_vm4 = vmor %vm1055_vm3, %vm1056_vm2 }
0x174b   :  { %v1052_v34 = vsub.f32 1.0, %v1051_v33 }
0x174d   :  { %v1053_v35 = vmul.f32 %v1464_v32, %v1052_v34 }
0x174f   :  { %v1054_v36 = vadd.f32 %v1464_v32, %v1053_v35  ;;  %v746_v35 = vpop.f32.mrf.mxu3 }
0x1751   :  { %v1058_v40 = vsel %vm1057_vm4, %v1464_v32, %v1054_v36  ;;  %v747_v36 = vadd.f32 %v1755_v14, %v746_v35 }
0x1752   :  { %v1063_v43 = vsel %vm1060_vm5, %v1062_v41, %v1058_v40 }
0x1753   :  { %v1066_v45 = vmul.f32 %v1063_v43, %v1011_v5 }
0x1798   :  { %v1069_v42 = vpop.permute.xlu2 %1068 }
0x1799   :  { %v1071_v44 = vmul.f32 %v1069_v42, %v1063_v43 }
0x179b   :  { %1073 = vrot.lane.b32.xlu0 %v1071_v44, %s1502_s22 }
0x180d   :  { %v1074_v46 = vpop.permute.xlu0 %1073 }
0x180e   :  { %v1076_v47 = vadd.f32 %v1074_v46, %v1066_v45 }
0x1810   :  { %1465 = vtanh.f32 %v1076_v47 }
0x1816   :  { %v1466_v49 = vpop.eup %1465 }
0x1817   :  { %1079 = vrot.lane.b32.xlu1 %v1466_v49, %s1501_s21 }
0x1889   :  { %v1080_v50 = vpop.permute.xlu1 %1079 }
0x188a   :  { %v1082_v51 = vmul.f32 %v1080_v50, %v1063_v43 }
0x188c   :  { %1086 = vrot.lane.b32.xlu2 %v1082_v51, %s1502_s22 }
0x18e6   :  { %v1087_v52 = vpop.permute.xlu2 %1086 }
0x18e7   :  { %1358 = vmatmul.msk.f32.vlgmr.msra.gmra.mxu2 %vm128_vm6, %v1087_v52 }
0x196a   :  { %v1107_v55 = vpop.f32.mrf.mxu2 }
0x196b   :  { %v1110_v56 = vadd.f32 %v1107_v55, %v744_v54 }
0x196d   :  { %1467 = vtanh.f32 %v1110_v56  ;;  %v1359_v58 = vmul.f32 -1.442695, %v1110_v56 }
0x196f   :  { %1469 = vpow2.f32 %v1359_v58 }
0x1973   :  { %v1468_v57 = vpop.eup %1467 }
0x1974   :  { %1133 = vrot.lane.b32.xlu0 %v1468_v57, %s1501_s21 }
0x1975   :  { %v1470_v59 = vpop.eup %1469 }
0x1976   :  { %v1114_v60 = vadd.f32 1.0, %v1470_v59 }
0x1978   :  { %1471 = vrcp.f32 %v1114_v60  ;;  %v1126_v13 = vand.u32 2147483648, %v1114_v60  ;;  %vm1120_vm8 = vweird.f32 %v1114_v60  ;;  %v1124_v63 = vand.u32 2147483647, %v1114_v60 }
0x1979   :  { %1473 = vtanh.f32 %v627_v8 }
0x197a   :  { %v1127_v15 = vor.u32 1.1754944e-38, %v1126_v13  ;;  %vm1125_vm9 = vcmp.eq.f32.partialorder %v1124_v63, 8.507059e+37 }
0x197e   :  { %v1472_v62 = vpop.eup %1471 }
0x197f   :  { %v1116_v9 = vmul.f32 %v1472_v62, %v1114_v60  ;;  %vm1121_vm7 = vweird.f32 %v1472_v62  ;;  %v1474_v1 = vpop.eup %1473 }
0x1980   :  { %vm1122_vm1 = vmor %vm1120_vm8, %vm1121_vm7  ;;  %vm1311_vm8 = vcmask 15360  }
0x1981   :  { %v1117_v10 = vsub.f32 1.0, %v1116_v9 }
0x1983   :  { %v1118_v11 = vmul.f32 %v1472_v62, %v1117_v10 }
0x1985   :  { %v1119_v12 = vadd.f32 %v1472_v62, %v1118_v11 }
0x1987   :  { %v1123_v2 = vsel %vm1122_vm1, %v1472_v62, %v1119_v12 }
0x1988   :  { %v1128_v17 = vsel %vm1125_vm9, %v1127_v15, %v1123_v2 }
0x1989   :  { %v1131_v7 = vmul.f32 %v1128_v17, %v1076_v47 }
0x19e6   :  { %v1134_v16 = vpop.permute.xlu0 %1133 }
0x19e7   :  { %v1136_v0 = vmul.f32 %v1134_v16, %v1128_v17 }
0x19e9   :  { %1138 = vrot.lane.b32.xlu1 %v1136_v0, %s1502_s22 }
0x19f1   :  { %650 = vrot.lane.b32.xlu1 %v1474_v1, %s1501_s21 }
0x1a5b   :  { %v1139_v4 = vpop.permute.xlu1 %1138 }
0x1a5c   :  { %v1825_v18 = vadd.f32 %v1139_v4, %v1131_v7 }
0x1a5e   :  { %1475 = vtanh.f32 %v1825_v18 }
0x1a5f   :  { %1477 = vpow2.f32 %v1340_v19 }
0x1a63   :  { %v651_v31 = vpop.permute.xlu1 %650 }
0x1a64   :  { %v1476_v37 = vpop.eup %1475 }
0x1a65   :  { %1144 = vrot.lane.b32.xlu2 %v1476_v37, %s1501_s21  ;;  %v1478_v61 = vpop.eup %1477 }
0x1a66   :  { %v631_v5 = vadd.f32 1.0, %v1478_v61 }
0x1a68   :  { %1479 = vrcp.f32 %v631_v5  ;;  %v643_v27 = vand.u32 2147483648, %v631_v5  ;;  %vm637_vm11 = vweird.f32 %v631_v5  ;;  %v641_v28 = vand.u32 2147483647, %v631_v5 }
0x1a6a   :  { %v644_v30 = vor.u32 1.1754944e-38, %v643_v27  ;;  %vm642_vm13 = vcmp.eq.f32.partialorder %v641_v28, 8.507059e+37 }
0x1a6e   :  { %v1480_v20 = vpop.eup %1479 }
0x1a6f   :  { %v633_v21 = vmul.f32 %v1480_v20, %v631_v5  ;;  %vm638_vm10 = vweird.f32 %v1480_v20 }
0x1a70   :  { %vm639_vm12 = vmor %vm637_vm11, %vm638_vm10 }
0x1a71   :  { %v634_v22 = vsub.f32 1.0, %v633_v21 }
0x1a73   :  { %v635_v23 = vmul.f32 %v1480_v20, %v634_v22 }
0x1a75   :  { %v636_v25 = vadd.f32 %v1480_v20, %v635_v23 }
0x1a77   :  { %v640_v29 = vsel %vm639_vm12, %v1480_v20, %v636_v25 }
0x1a78   :  { %v645_v32 = vsel %vm642_vm13, %v644_v30, %v640_v29  ;;  %v1281_v30 = vld [vmem:[%s1875_s7 + $0x18] sm:$0xff] }
0x1a79   :  { %v653_v33 = vmul.f32 %v651_v31, %v645_v32  ;;  %v648_v41 = vmul.f32 %v645_v32, %v1763_v48  ;;  %v1280_v31 = vld [vmem:[%s1875_s7 + $0x10] sm:$0xff]  ;;  %1303 = vmatpush.msrb.mxu1 %v1281_v30 }
0x1a7b   :  { %1304 = vmatpush.msrb.mxu1 %v1280_v31 }
0x1abf   :  { %v1145_v24 = vpop.permute.xlu2 %1144 }
0x1ac0   :  { %v1147_v26 = vmul.f32 %v1145_v24, %v1128_v17 }
0x1ac2   :  { %1151 = vrot.lane.b32.xlu0 %v1147_v26, %s1502_s22 }
0x1aca   :  { %655 = vrot.lane.b32.xlu0 %v653_v33, %s1502_s22  ;;  %v1278_v33 = vld [vmem:[%s1875_s7] sm:$0xff] }
0x1b34   :  { %v1152_v34 = vpop.permute.xlu0 %1151 }
0x1b35   :  { %1360 = vmatmul.msk.f32.vlgmr.msra.gmra.mxu1 %vm128_vm6, %v1152_v34 }
0x1b3c   :  { %v656_v40 = vpop.permute.xlu0 %655 }
0x1b3d   :  { %v658_v42 = vadd.f32 %v656_v40, %v648_v41 }
0x1bb2   :  { %v1172_v38 = vpop.f32.mrf.mxu1 }
0x1bb3   :  { %v1175_v39 = vadd.f32 %v1172_v38, %v747_v36  ;;  %v1370_v38 = vld [vmem:[%s1876_s8] ss:$0 sm:$0xff] }
0x1bb5   :  { %1481 = vtanh.f32 %v1175_v39  ;;  %v1361_v45 = vmul.f32 -1.442695, %v1175_v39 }
0x1bb6   :  { %1483 = vtanh.f32 %v658_v42 }
0x1bb7   :  { %1485 = vpow2.f32 %v1361_v45 }
0x1bbb   :  { %v1482_v43 = vpop.eup %1481 }
0x1bbc   :  { %1198 = vrot.lane.b32.xlu2 %v1482_v43, %s1501_s21  ;;  %v1484_v44 = vpop.eup %1483 }
0x1bbd   :  { %v1486_v46 = vpop.eup %1485 }
0x1bbe   :  { %v1179_v47 = vadd.f32 1.0, %v1486_v46 }
0x1bc0   :  { %1487 = vrcp.f32 %v1179_v47  ;;  %v1191_v48 = vand.u32 2147483648, %v1179_v47  ;;  %vm1185_vm15 = vweird.f32 %v1179_v47  ;;  %v1189_v54 = vand.u32 2147483647, %v1179_v47 }
0x1bc2   :  { %v1192_v56 = vor.u32 1.1754944e-38, %v1191_v48  ;;  %vm1190_vm2 = vcmp.eq.f32.partialorder %v1189_v54, 8.507059e+37 }
0x1bc4   :  { %661 = vrot.lane.b32.xlu2 %v1484_v44, %s1501_s21 }
0x1bc6   :  { %v1488_v49 = vpop.eup %1487 }
0x1bc7   :  { %v1181_v50 = vmul.f32 %v1488_v49, %v1179_v47  ;;  %vm1186_vm14 = vweird.f32 %v1488_v49 }
0x1bc8   :  { %vm1187_vm0 = vmor %vm1185_vm15, %vm1186_vm14 }
0x1bc9   :  { %v1182_v51 = vsub.f32 1.0, %v1181_v50 }
0x1bcb   :  { %v1183_v52 = vmul.f32 %v1488_v49, %v1182_v51 }
0x1bcd   :  { %v1184_v53 = vadd.f32 %v1488_v49, %v1183_v52 }
0x1bcf   :  { %v1188_v55 = vsel %vm1187_vm0, %v1488_v49, %v1184_v53 }
0x1bd0   :  { %v1193_v58 = vsel %vm1190_vm2, %v1192_v56, %v1188_v55 }
0x1bd1   :  { %v1196_v9 = vmul.f32 %v1193_v58, %v1825_v18 }
0x1c16   :  { %v1199_v57 = vpop.permute.xlu2 %1198 }
0x1c17   :  { %v1201_v59 = vmul.f32 %v1199_v57, %v1193_v58 }
0x1c19   :  { %1203 = vrot.lane.b32.xlu1 %v1201_v59, %s1502_s22 }
0x1c1e   :  { %v662_v60 = vpop.permute.xlu2 %661 }
0x1c1f   :  { %v664_v62 = vmul.f32 %v662_v60, %v645_v32  ;;  %v1279_v32 = vld [vmem:[%s1875_s7 + $0x8] sm:$0xff] }
0x1c20   :  { %1305 = vmatpush.msrb.mxu1 %v1279_v32 }
0x1c21   :  { %666 = vrot.lane.b32.xlu1 %v664_v62, %s1502_s22 }
0x1c22   :  { %1306 = vmatpush.msrb.mxu1 %v1278_v33 }
0x1c8b   :  { %v1204_v10 = vpop.permute.xlu1 %1203 }
0x1c8c   :  { %v1206_v11 = vadd.f32 %v1204_v10, %v1196_v9 }
0x1c8e   :  { %1489 = vtanh.f32 %v1206_v11 }
0x1c93   :  { %v667_v12 = vpop.permute.xlu1 %666 }
0x1c94   :  { %v1490_v13 = vpop.eup %1489  ;;  %670 = vst.msk [vmem:[#allocation3 + $0x38] sm:$0xff] %vm128_vm6, %v667_v12 }
0x1c95   :  { %1209 = vrot.lane.b32.xlu0 %v1490_v13, %s1501_s21 }
0x1c9b   :  { %v678_v63 = vld [vmem:[#allocation3 + $0x38] sm:$0xff] }
0x1c9c   :  { %1348 = vmatmul.msk.f32.gmra.mxu3 %vm128_vm6, %v678_v63 }
0x1d07   :  { %v1210_v2 = vpop.permute.xlu0 %1209 }
0x1d08   :  { %v1212_v6 = vmul.f32 %v1210_v2, %v1193_v58 }
0x1d0a   :  { %1216 = vrot.lane.b32.xlu2 %v1212_v6, %s1502_s22 }
0x1d1f   :  { %v749_v15 = vpop.f32.mrf.mxu3 }
0x1d20   :  { %v750_v8 = vadd.f32 %v1755_v14, %v749_v15 }
0x1d64   :  { %v1217_v3 = vpop.permute.xlu2 %1216 }
0x1d65   :  { %1362 = vmatmul.msk.f32.vlgmr.msrb.gmra.mxu2 %vm128_vm6, %v1217_v3 }
0x1de8   :  { %v1237_v16 = vpop.f32.mrf.mxu2 }
0x1de9   :  { %v1240_v17 = vadd.f32 %v1237_v16, %v750_v8 }
0x1deb   :  { %1491 = vtanh.f32 %v1240_v17  ;;  %v1363_v1 = vmul.f32 -1.442695, %v1240_v17 }
0x1ded   :  { %1493 = vpow2.f32 %v1363_v1 }
0x1df1   :  { %v1492_v0 = vpop.eup %1491 }
0x1df2   :  { %1263 = vrot.lane.b32.xlu0 %v1492_v0, %s1501_s21 }
0x1df3   :  { %v1494_v7 = vpop.eup %1493 }
0x1df4   :  { %v1244_v4 = vadd.f32 1.0, %v1494_v7 }
0x1df6   :  { %1495 = vrcp.f32 %v1244_v4  ;;  %v1256_v20 = vand.u32 2147483648, %v1244_v4  ;;  %vm1250_vm4 = vweird.f32 %v1244_v4  ;;  %v1254_v14 = vand.u32 2147483647, %v1244_v4 }
0x1df8   :  { %v1257_v22 = vor.u32 1.1754944e-38, %v1256_v20  ;;  %vm1255_vm7 = vcmp.eq.f32.partialorder %v1254_v14, 8.507059e+37 }
0x1dfc   :  { %v1496_v18 = vpop.eup %1495 }
0x1dfd   :  { %v1246_v37 = vmul.f32 %v1496_v18, %v1244_v4  ;;  %vm1251_vm3 = vweird.f32 %v1496_v18 }
0x1dfe   :  { %vm1252_vm5 = vmor %vm1250_vm4, %vm1251_vm3 }
0x1dff   :  { %v1247_v19 = vsub.f32 1.0, %v1246_v37 }
0x1e01   :  { %v1248_v61 = vmul.f32 %v1496_v18, %v1247_v19 }
0x1e03   :  { %v1249_v5 = vadd.f32 %v1496_v18, %v1248_v61 }
0x1e05   :  { %v1253_v21 = vsel %vm1252_vm5, %v1496_v18, %v1249_v5 }
0x1e06   :  { %v1258_v24 = vsel %vm1255_vm7, %v1257_v22, %v1253_v21 }
0x1e07   :  { %v1261_v26 = vmul.f32 %v1258_v24, %v1206_v11 }
0x1e64   :  { %v1264_v23 = vpop.permute.xlu0 %1263 }
0x1e65   :  { %v1266_v25 = vmul.f32 %v1264_v23, %v1258_v24 }
0x1e67   :  { %1268 = vrot.lane.b32.xlu1 %v1266_v25, %s1502_s22 }
0x1ed9   :  { %v1269_v27 = vpop.permute.xlu1 %1268 }
0x1eda   :  { %v1271_v28 = vadd.f32 %v1269_v27, %v1261_v26 }
0x1edc   :  { %1497 = vtanh.f32 %v1271_v28 }
0x1ee2   :  { %v1498_v29 = vpop.eup %1497 }
0x1ee3   :  { %1274 = vrot.lane.b32.xlu2 %v1498_v29, %s1501_s21 }
0x1f3d   :  { %v1275_v34 = vpop.permute.xlu2 %1274 }
0x1f3e   :  { %v1277_v35 = vmul.f32 %v1275_v34, %v1258_v24 }
0x1f40   :  { %1287 = vrot.lane.b32.xlu0 %v1277_v35, %s1502_s22 }
0x1fb2   :  { %v1288_v36 = vpop.permute.xlu0 %1287 }
0x1fb3   :  { %1364 = vmatmul.msk.f32.vlgmr.msrb.gmra.mxu1 %vm128_vm6, %v1288_v36 }
0x2030   :  { %v1308_v39 = vpop.f32.mrf.mxu1 }
0x2031   :  { %v1309_v40 = vadd.f32 %v1370_v38, %v1308_v39 }
0x2033   :  { %1312 = vst.msk [vmem:[%s1877_s9] sm:$0xff] %vm1311_vm8, %v1309_v40 }

</bundles_post_ra>
